<compile_context>
chip_gen: v5e
topology: v5e:2x2
jax: 0.10.0
libtpu: 0.0.40
codegen_flags: <defaults>
</compile_context>

<pallas_src>
import math
from functools import partial as _partial

import jax
import jax.numpy as jnp
from jax.experimental import pallas as pl
from jax.experimental.pallas import tpu as pltpu

WINDOW_SIZE = 11
SIGMA = 1.5
PAD = WINDOW_SIZE // 2
C1 = 0.01 ** 2
C2 = 0.03 ** 2


def _gaussian_1d(window_size=WINDOW_SIZE, sigma=SIGMA):
    g = [math.exp(-((x - window_size // 2) ** 2) / (2.0 * sigma ** 2))
         for x in range(window_size)]
    s = sum(g)
    return [v / s for v in g]


_GAUSS = _gaussian_1d()  # normalized 1D Gaussian; 2D window = outer(g, g)


def _band_matrix(n):
    """(n, n) band matrix M with M[p, q] = g[q - p + PAD] (zero elsewhere).

    M @ X blurs X along its first axis with zero boundary handling, exactly
    matching F.conv2d(..., padding=PAD) of the separable Gaussian; X @ M blurs
    along the last axis (M is symmetric because the Gaussian is symmetric).
    """
    rows = []
    for p in range(n):
        row = [0.0] * n
        for q in range(max(0, p - PAD), min(n, p + PAD + 1)):
            row[q] = _GAUSS[q - p + PAD]
        rows.append(row)
    return jnp.asarray(rows, jnp.float32)


def _pick_channel_tile(bc, h, max_rows=1024):
    """Largest divisor ct of bc with ct*h <= max_rows (prefer ct*h % 8 == 0)."""
    best, best_aligned = 1, None
    for d in range(1, bc + 1):
        if bc % d == 0 and d * h <= max_rows:
            best = d
            if (d * h) % 8 == 0:
                best_aligned = d
    return best_aligned if best_aligned is not None else best


def _ssim_tile_kernel(x_ref, y_ref, bw_ref, ad_ref, out_ref, *, n_rows):
    """One grid step = one tile of CT channels (n_rows = CT * H rows).

    x_ref, y_ref: VMEM (n_rows, W)       flattened (channel, H) x W image tiles
    bw_ref:       VMEM (W, W)            Gaussian band matrix (W blur, right mult)
    ad_ref:       VMEM (n_rows, n_rows)  block-diag of the (H, H) band matrix
                                         (per-channel H blur, left mult)
    out_ref:      SMEM (1, 1)            partial sum of the SSIM map for this tile
    """
    x = x_ref[...]
    y = y_ref[...]
    bw = bw_ref[...]
    ad = ad_ref[...]

    # Stack all five blur inputs and do the W (lane-axis) blur as one MXU matmul.
    stacked = jnp.concatenate([x, y, x * x, y * y, x * y], axis=0)  # (5*n_rows, W)
    s1 = jnp.dot(stacked, bw, preferred_element_type=jnp.float32)

    # H blur: one block-diagonal matmul per blur kind (all slices sublane-aligned).
    n = n_rows
    mu1 = jnp.dot(ad, s1[0 * n:1 * n], preferred_element_type=jnp.float32)
    mu2 = jnp.dot(ad, s1[1 * n:2 * n], preferred_element_type=jnp.float32)
    e_xx = jnp.dot(ad, s1[2 * n:3 * n], preferred_element_type=jnp.float32)
    e_yy = jnp.dot(ad, s1[3 * n:4 * n], preferred_element_type=jnp.float32)
    e_xy = jnp.dot(ad, s1[4 * n:5 * n], preferred_element_type=jnp.float32)

    mu1_sq = mu1 * mu1
    mu2_sq = mu2 * mu2
    mu1_mu2 = mu1 * mu2
    # Zero padding commutes with elementwise products, so blur(x*y) etc. match
    # F.conv2d of the products exactly.
    sigma1_sq = e_xx - mu1_sq
    sigma2_sq = e_yy - mu2_sq
    sigma12 = e_xy - mu1_mu2

    num = (2.0 * mu1_mu2 + C1) * (2.0 * sigma12 + C2)
    den = (mu1_sq + mu2_sq + C1) * (sigma1_sq + sigma2_sq + C2)
    # Exact divide kept (pl.reciprocal(approx=True) trades ~1e-3 accuracy and the
    # divide is a tiny fraction of the now MXU-dominated work).
    ssim_map = num / den

    out_ref[0, 0] = jnp.sum(ssim_map)


def ssim_loss(img1, img2, *, channel_tile=None):
    """JAX/Pallas equivalent of SSIM_loss.forward: 1 - SSIM(img1, img2).

    img1, img2: (B, C, H, W). window_size=11, sigma=1.5, size_average=True.
    """
    B, C, H, W = img1.shape
    assert img2.shape == img1.shape
    BC = B * C

    # Lay out as (B*C*H, W): pure metadata reshape, no padding, no extra HBM copy.
    x = img1.astype(jnp.float32).reshape(BC * H, W)
    y = img2.astype(jnp.float32).reshape(BC * H, W)

    ct = channel_tile if channel_tile is not None else _pick_channel_tile(BC, H)
    assert BC % ct == 0, "channel tile must divide B*C"
    n_rows = ct * H
    num_tiles = BC // ct

    band_w = _band_matrix(W)                                   # (W, W)
    band_h = _band_matrix(H)                                   # (H, H)
    ad = jnp.kron(jnp.eye(ct, dtype=jnp.float32), band_h)      # (ct*H, ct*H)

    kernel = _partial(_ssim_tile_kernel, n_rows=n_rows)
    partial_sums = pl.pallas_call(
        kernel,
        out_shape=jax.ShapeDtypeStruct((num_tiles, 1), jnp.float32),
        grid=(num_tiles,),
        in_specs=[
            pl.BlockSpec((n_rows, W), lambda i: (i, 0)),
            pl.BlockSpec((n_rows, W), lambda i: (i, 0)),
            pl.BlockSpec((W, W), lambda i: (0, 0)),             # grid-invariant
            pl.BlockSpec((n_rows, n_rows), lambda i: (0, 0)),    # grid-invariant
        ],
        out_specs=pl.BlockSpec((1, 1), lambda i: (i, 0),
                               memory_space=pltpu.SMEM),
        compiler_params=pltpu.CompilerParams(
            dimension_semantics=("parallel",),
            vmem_limit_bytes=32 * 1024 * 1024),
    )(x, y, band_w, ad)

    ssim_mean = jnp.sum(partial_sums) / float(BC * H * W)
    return 1.0 - ssim_mean
    # TODO(synk): size_average=False branch (per-sample means) not implemented;
    # the module's default size_average=True path is what is used here.


def _reference_ssim_loss(img1, img2):
    """Pure-JAX reference (depthwise conv via lax.conv_general_dilated)."""
    g = jnp.asarray(_GAUSS, jnp.float32)
    w2d = jnp.outer(g, g)
    x = img1.astype(jnp.float32)
    y = img2.astype(jnp.float32)
    _, C, _, _ = x.shape
    ker = jnp.broadcast_to(w2d[None, None], (C, 1, WINDOW_SIZE, WINDOW_SIZE))

    def blur(a):
        return jax.lax.conv_general_dilated(
            a, ker, (1, 1), [(PAD, PAD), (PAD, PAD)],
            dimension_numbers=("NCHW", "OIHW", "NCHW"),
            feature_group_count=C)

    mu1, mu2 = blur(x), blur(y)
    mu1_sq, mu2_sq, mu1_mu2 = mu1 * mu1, mu2 * mu2, mu1 * mu2
    sigma1_sq = blur(x * x) - mu1_sq
    sigma2_sq = blur(y * y) - mu2_sq
    sigma12 = blur(x * y) - mu1_mu2
    ssim_map = ((2 * mu1_mu2 + C1) * (2 * sigma12 + C2) /
                ((mu1_sq + mu2_sq + C1) * (sigma1_sq + sigma2_sq + C2)))
    return 1.0 - jnp.mean(ssim_map)


if __name__ == "__main__":
    key = jax.random.PRNGKey(0)
    k1, k2 = jax.random.split(key)

    B, C, H, W = 2, 4, 16, 16
    img1 = jax.random.uniform(k1, (B, C, H, W), dtype=jnp.float32)
    img2 = jax.random.uniform(k2, (B, C, H, W), dtype=jnp.float32)

    loss = ssim_loss(img1, img2)
    loss = jax.block_until_ready(loss)

    ref = _reference_ssim_loss(img1, img2)
    assert jnp.allclose(loss, ref, rtol=1e-4, atol=1e-5), (loss, ref)
    print("KERNEL_OK")
</pallas_src>

<mosaic_0001>
module attributes {stable_mosaic.version = 11 : i64} {
  func.func @_ssim_tile_kernel(%arg0: i32, %arg1: memref<128x16xf32, #tpu.memory_space<vmem>>, %arg2: memref<128x16xf32, #tpu.memory_space<vmem>>, %arg3: memref<16x16xf32, #tpu.memory_space<vmem>>, %arg4: memref<128x128xf32, #tpu.memory_space<vmem>>, %arg5: memref<1x1xf32, #tpu.memory_space<smem>>) attributes {dimension_semantics = [#tpu.dimension_semantics<parallel>], iteration_bounds = array<i64: 1>, scalar_prefetch = 0 : i64, scratch_operands = 0 : i64, tpu.core_type = #tpu.core_type<tc>, window_params = [{transform_indices = @transform_0, window_bounds = array<i64: 128, 16>}, {transform_indices = @transform_1, window_bounds = array<i64: 128, 16>}, {pipeline_mode = #tpu.pipeline_mode<synchronous>, transform_indices = @transform_2, window_bounds = array<i64: 16, 16>}, {pipeline_mode = #tpu.pipeline_mode<synchronous>, transform_indices = @transform_3, window_bounds = array<i64: 128, 128>}, {transform_indices = @transform_4, window_bounds = array<i64: 1, 1>}]} {
    %c0 = arith.constant 0 : index
    %c0_0 = arith.constant 0 : index
    %0 = vector.load %arg1[%c0, %c0_0] : memref<128x16xf32, #tpu.memory_space<vmem>>, vector<128x16xf32>
    %c0_1 = arith.constant 0 : index
    %c0_2 = arith.constant 0 : index
    %1 = vector.load %arg2[%c0_1, %c0_2] : memref<128x16xf32, #tpu.memory_space<vmem>>, vector<128x16xf32>
    %c0_3 = arith.constant 0 : index
    %c0_4 = arith.constant 0 : index
    %2 = vector.load %arg3[%c0_3, %c0_4] : memref<16x16xf32, #tpu.memory_space<vmem>>, vector<16x16xf32>
    %c0_5 = arith.constant 0 : index
    %c0_6 = arith.constant 0 : index
    %3 = vector.load %arg4[%c0_5, %c0_6] : memref<128x128xf32, #tpu.memory_space<vmem>>, vector<128x128xf32>
    %4 = arith.mulf %0, %0 : vector<128x16xf32>
    %5 = arith.mulf %1, %1 : vector<128x16xf32>
    %6 = arith.mulf %0, %1 : vector<128x16xf32>
    %7 = tpu.concatenate %0, %1, %4, %5, %6 in 0 : vector<128x16xf32>, vector<128x16xf32>, vector<128x16xf32>, vector<128x16xf32>, vector<128x16xf32> -> vector<640x16xf32>
    %cst = arith.constant dense<0.000000e+00> : vector<640x16xf32>
    %8 = tpu.matmul %7, %2, %cst {dimension_numbers = #tpu.dot_dimension_numbers<[1], [0], [0], [1], [0, 0, 1, 1], [], []>} : vector<640x16xf32>, vector<16x16xf32>, vector<640x16xf32> -> vector<640x16xf32>
    %9 = vector.extract_strided_slice %8 {offsets = [0, 0], sizes = [128, 16], strides = [1, 1]} : vector<640x16xf32> to vector<128x16xf32>
    %cst_7 = arith.constant dense<0.000000e+00> : vector<128x16xf32>
    %10 = tpu.matmul %3, %9, %cst_7 {dimension_numbers = #tpu.dot_dimension_numbers<[1], [0], [0], [1], [0, 0, 1, 1], [], []>} : vector<128x128xf32>, vector<128x16xf32>, vector<128x16xf32> -> vector<128x16xf32>
    %11 = vector.extract_strided_slice %8 {offsets = [128, 0], sizes = [128, 16], strides = [1, 1]} : vector<640x16xf32> to vector<128x16xf32>
    %cst_8 = arith.constant dense<0.000000e+00> : vector<128x16xf32>
    %12 = tpu.matmul %3, %11, %cst_8 {dimension_numbers = #tpu.dot_dimension_numbers<[1], [0], [0], [1], [0, 0, 1, 1], [], []>} : vector<128x128xf32>, vector<128x16xf32>, vector<128x16xf32> -> vector<128x16xf32>
    %13 = vector.extract_strided_slice %8 {offsets = [256, 0], sizes = [128, 16], strides = [1, 1]} : vector<640x16xf32> to vector<128x16xf32>
    %cst_9 = arith.constant dense<0.000000e+00> : vector<128x16xf32>
    %14 = tpu.matmul %3, %13, %cst_9 {dimension_numbers = #tpu.dot_dimension_numbers<[1], [0], [0], [1], [0, 0, 1, 1], [], []>} : vector<128x128xf32>, vector<128x16xf32>, vector<128x16xf32> -> vector<128x16xf32>
    %15 = vector.extract_strided_slice %8 {offsets = [384, 0], sizes = [128, 16], strides = [1, 1]} : vector<640x16xf32> to vector<128x16xf32>
    %cst_10 = arith.constant dense<0.000000e+00> : vector<128x16xf32>
    %16 = tpu.matmul %3, %15, %cst_10 {dimension_numbers = #tpu.dot_dimension_numbers<[1], [0], [0], [1], [0, 0, 1, 1], [], []>} : vector<128x128xf32>, vector<128x16xf32>, vector<128x16xf32> -> vector<128x16xf32>
    %17 = vector.extract_strided_slice %8 {offsets = [512, 0], sizes = [128, 16], strides = [1, 1]} : vector<640x16xf32> to vector<128x16xf32>
    %cst_11 = arith.constant dense<0.000000e+00> : vector<128x16xf32>
    %18 = tpu.matmul %3, %17, %cst_11 {dimension_numbers = #tpu.dot_dimension_numbers<[1], [0], [0], [1], [0, 0, 1, 1], [], []>} : vector<128x128xf32>, vector<128x16xf32>, vector<128x16xf32> -> vector<128x16xf32>
    %19 = arith.mulf %10, %10 : vector<128x16xf32>
    %20 = arith.mulf %12, %12 : vector<128x16xf32>
    %21 = arith.mulf %10, %12 : vector<128x16xf32>
    %22 = arith.subf %14, %19 : vector<128x16xf32>
    %23 = arith.subf %16, %20 : vector<128x16xf32>
    %24 = arith.subf %18, %21 : vector<128x16xf32>
    %cst_12 = arith.constant 2.000000e+00 : f32
    %25 = vector.broadcast %cst_12 : f32 to vector<128x16xf32>
    %26 = arith.mulf %25, %21 : vector<128x16xf32>
    %cst_13 = arith.constant 9.99999974E-5 : f32
    %27 = vector.broadcast %cst_13 : f32 to vector<128x16xf32>
    %28 = arith.addf %26, %27 : vector<128x16xf32>
    %cst_14 = arith.constant 2.000000e+00 : f32
    %29 = vector.broadcast %cst_14 : f32 to vector<128x16xf32>
    %30 = arith.mulf %29, %24 : vector<128x16xf32>
    %cst_15 = arith.constant 8.99999984E-4 : f32
    %31 = vector.broadcast %cst_15 : f32 to vector<128x16xf32>
    %32 = arith.addf %30, %31 : vector<128x16xf32>
    %33 = arith.mulf %28, %32 : vector<128x16xf32>
    %34 = arith.addf %19, %20 : vector<128x16xf32>
    %cst_16 = arith.constant 9.99999974E-5 : f32
    %35 = vector.broadcast %cst_16 : f32 to vector<128x16xf32>
    %36 = arith.addf %34, %35 : vector<128x16xf32>
    %37 = arith.addf %22, %23 : vector<128x16xf32>
    %cst_17 = arith.constant 8.99999984E-4 : f32
    %38 = vector.broadcast %cst_17 : f32 to vector<128x16xf32>
    %39 = arith.addf %37, %38 : vector<128x16xf32>
    %40 = arith.mulf %36, %39 : vector<128x16xf32>
    %41 = arith.divf %33, %40 : vector<128x16xf32>
    %42 = vector.shape_cast %41 : vector<128x16xf32> to vector<1x128x16xf32>
    %cst_18 = arith.constant dense<0.000000e+00> : vector<1xf32>
    %43 = vector.multi_reduction <add>, %42, %cst_18 [1, 2] : vector<1x128x16xf32> to vector<1xf32>
    %44 = vector.shape_cast %43 : vector<1xf32> to vector<1x1x1xf32>
    %45 = vector.extract %44[0, 0, 0] : f32 from vector<1x1x1xf32>
    %c0_19 = arith.constant 0 : index
    %c0_20 = arith.constant 0 : index
    %46 = memref.load %arg5[%c0_19, %c0_20] : memref<1x1xf32, #tpu.memory_space<smem>>
    memref.store %45, %arg5[%c0_19, %c0_20] : memref<1x1xf32, #tpu.memory_space<smem>>
    return
  }
  func.func @transform_0(%arg0: i32) -> (i32, i32) {
    %c0_i32 = arith.constant 0 : i32
    %c0_i32_0 = arith.constant 0 : i32
    return %arg0, %c0_i32 : i32, i32
  }
  func.func @transform_1(%arg0: i32) -> (i32, i32) {
    %c0_i32 = arith.constant 0 : i32
    %c0_i32_0 = arith.constant 0 : i32
    return %arg0, %c0_i32 : i32, i32
  }
  func.func @transform_2(%arg0: i32) -> (i32, i32) {
    %c0_i32 = arith.constant 0 : i32
    %c0_i32_0 = arith.constant 0 : i32
    %c0_i32_1 = arith.constant 0 : i32
    return %c0_i32, %c0_i32_0 : i32, i32
  }
  func.func @transform_3(%arg0: i32) -> (i32, i32) {
    %c0_i32 = arith.constant 0 : i32
    %c0_i32_0 = arith.constant 0 : i32
    %c0_i32_1 = arith.constant 0 : i32
    return %c0_i32, %c0_i32_0 : i32, i32
  }
  func.func @transform_4(%arg0: i32) -> (i32, i32) {
    %c0_i32 = arith.constant 0 : i32
    %c0_i32_0 = arith.constant 0 : i32
    return %arg0, %c0_i32 : i32, i32
  }
}

</mosaic_0001>

<bundles_post_ra>
// kernel: tpu_custom_call.1
= control target key start
LH: loop header
LB: loop body
LE: loop exit
PB: predicated region body
PF: predicated region fallthrough
CT: control target
= control target key end

     0   :  { %vm116_vm0 = vcmask 130048   ;;  %s2761_s0 = inlined_call_operand.vmem [shape: f32[128,16], index: 0, kind: input, shape index: {}]   ;;  %s2762_s1 = inlined_call_operand.vmem [shape: f32[128,16], index: 1, kind: input, shape index: {}]   ;;  %s2763_s2 = inlined_call_operand.vmem [shape: f32[16,16], index: 2, kind: input, shape index: {}]   ;;  %s2764_s3 = inlined_call_operand.vmem [shape: f32[128,128], index: 3, kind: input, shape index: {}]   ;;  %s2765_s4 = inlined_call_operand.hbm [shape: f32[1,1], index: 4, kind: output, shape index: {}]  }
   0x1   :  { %v51_v0 = vld [vmem:[%s2763_s2 + $0x8] sm:$0xff]  ;;  %v50_v1 = vld [vmem:[%s2763_s2] sm:$0xff] }
   0x2   :  { %371 = vmatpush.msra.mxu0 %v51_v0  ;;  %v1662_v2 = vld [vmem:[%s2761_s0] sm:$0xff]  ;;  %1574 = vmatpush.msra.mxu3 %v51_v0 }
   0x3   :  { %1572 = vmatpush.msra.mxu1 %v51_v0  ;;  %1573 = vmatpush.msra.mxu2 %v51_v0 }
   0x4   :  { %9 = vsyncpa [#allocation3], 0  ;;  %372 = vmatpush.msra.mxu0 %v50_v1  ;;  %1577 = vmatpush.msra.mxu3 %v50_v1  ;;  %v1669_v3 = vld [vmem:[%s2761_s0 + $0x8] sm:$0xff]  ;;  %v1676_v4 = vld [vmem:[%s2761_s0 + $0x10] sm:$0xff]  ;;  %s1482_s30 = sshll.u32 %s2765_s4, 4  ;;  %s1627_s6 = smov [#allocation2]   ;;  %s1483_s30 = int_to_ptr.hbm [resolvable:$true] %s1482_s30 }
   0x5   :  { %1492 = vmatmul.msk.f32.vlgmr.msra.gmra.mxu0 %vm116_vm0, %v1662_v2  ;;  %1575 = vmatpush.msra.mxu1 %v50_v1  ;;  %v1683_v5 = vld [vmem:[%s2761_s0 + $0x18] sm:$0xff]  ;;  %v1690_v6 = vld [vmem:[%s2761_s0 + $0x20] sm:$0xff]  ;;  %v1697_v7 = vld [vmem:[%s2761_s0 + $0x28] sm:$0xff] }
   0x6   :  { %1576 = vmatpush.msra.mxu2 %v50_v1  ;;  %v1704_v8 = vld [vmem:[%s2761_s0 + $0x30] sm:$0xff]  ;;  %v1709_v9 = vld [vmem:[%s2762_s1 + $0x38] sm:$0xff]  ;;  %v1724_v12 = vld [vmem:[%s2762_s1 + $0x40] sm:$0xff] }
   0x7   :  { %v91_v10 = vmul.f32 %v1709_v9, %v1709_v9  ;;  %v1719_v11 = vld [vmem:[%s2761_s0 + $0x38] sm:$0xff]  ;;  %v92_v13 = vmul.f32 %v1724_v12, %v1724_v12  ;;  %v1734_v14 = vld [vmem:[%s2761_s0 + $0x40] sm:$0xff]  ;;  %v1739_v15 = vld [vmem:[%s2762_s1 + $0x48] sm:$0xff] }
   0x8   :  { %v93_v16 = vmul.f32 %v1739_v15, %v1739_v15  ;;  %v1749_v17 = vld [vmem:[%s2761_s0 + $0x48] sm:$0xff]  ;;  %v1754_v18 = vld [vmem:[%s2762_s1 + $0x50] sm:$0xff]  ;;  %v1769_v21 = vld [vmem:[%s2762_s1 + $0x58] sm:$0xff]  ;;  %v107_v63 = vmul.f32 %v1709_v9, %v1719_v11 }
   0x9   :  { %1547 = vmatmul.msk.f32.vlgmr.msra.gmra.mxu3 %vm116_vm0, %v91_v10  ;;  %v94_v19 = vmul.f32 %v1754_v18, %v1754_v18  ;;  %v1764_v20 = vld [vmem:[%s2761_s0 + $0x50] sm:$0xff]  ;;  %v95_v22 = vmul.f32 %v1769_v21, %v1769_v21  ;;  %v1779_v23 = vld [vmem:[%s2761_s0 + $0x58] sm:$0xff]  ;;  %v1784_v24 = vld [vmem:[%s2762_s1 + $0x60] sm:$0xff]  ;;  %v108_v10 = vmul.f32 %v1724_v12, %v1734_v14 }
   0xa   :  { %v96_v25 = vmul.f32 %v1784_v24, %v1784_v24  ;;  %v1794_v26 = vld [vmem:[%s2761_s0 + $0x60] sm:$0xff]  ;;  %v1799_v27 = vld [vmem:[%s2762_s1 + $0x68] sm:$0xff]  ;;  %v1814_v30 = vld [vmem:[%s2762_s1 + $0x70] sm:$0xff]  ;;  %v78_v41 = vmul.f32 %v1764_v20, %v1764_v20  ;;  %v79_v45 = vmul.f32 %v1779_v23, %v1779_v23 }
   0xb   :  { %v97_v28 = vmul.f32 %v1799_v27, %v1799_v27  ;;  %v1809_v29 = vld [vmem:[%s2761_s0 + $0x68] sm:$0xff]  ;;  %v98_v31 = vmul.f32 %v1814_v30, %v1814_v30  ;;  %v1824_v32 = vld [vmem:[%s2762_s1 + $0x78] sm:$0xff]  ;;  %v1829_v33 = vld [vmem:[%s2761_s0 + $0x70] sm:$0xff]  ;;  %v80_v49 = vmul.f32 %v1794_v26, %v1794_v26 }
   0xc   :  { %v99_v34 = vmul.f32 %v1824_v32, %v1824_v32  ;;  %v1839_v35 = vld [vmem:[%s2761_s0 + $0x78] sm:$0xff]  ;;  %v1844_v36 = vld [vmem:[%s2762_s1] sm:$0xff]  ;;  %v1856_v39 = vld [vmem:[%s2762_s1 + $0x8] sm:$0xff]  ;;  %1534 = vmatmul.msk.f32.vlgmr.msra.gmra.mxu1 %vm116_vm0, %v78_v41  ;;  %v81_v53 = vmul.f32 %v1809_v29, %v1809_v29  ;;  %v82_v57 = vmul.f32 %v1829_v33, %v1829_v33 }
   0xd   :  { %1493 = vmatmul.msk.f32.gmra.mxu0 %vm116_vm0, %v1669_v3  ;;  %v100_v37 = vmul.f32 %v1844_v36, %v1662_v2  ;;  %v101_v40 = vmul.f32 %v1856_v39, %v1669_v3  ;;  %v36_v43 = vld [vmem:[%s2762_s1 + $0x10] sm:$0xff]  ;;  %v37_v47 = vld [vmem:[%s2762_s1 + $0x18] sm:$0xff]  ;;  %v38_v51 = vld [vmem:[%s2762_s1 + $0x20] sm:$0xff]  ;;  %v83_v61 = vmul.f32 %v1839_v35, %v1839_v35 }
   0xe   :  { %v102_v44 = vmul.f32 %v36_v43, %v1676_v4  ;;  %v103_v48 = vmul.f32 %v37_v47, %v1683_v5  ;;  %v104_v52 = vmul.f32 %v38_v51, %v1690_v6  ;;  %v39_v55 = vld [vmem:[%s2762_s1 + $0x28] sm:$0xff]  ;;  %v40_v59 = vld [vmem:[%s2762_s1 + $0x30] sm:$0xff] }
   0xf   :  { %v105_v56 = vmul.f32 %v39_v55, %v1697_v7  ;;  %v106_v60 = vmul.f32 %v40_v59, %v1704_v8 }
  0x11   :  { %1548 = vmatmul.msk.f32.gmra.mxu3 %vm116_vm0, %v92_v13 }
  0x14   :  { %1535 = vmatmul.msk.f32.gmra.mxu1 %vm116_vm0, %v79_v45  ;;  %v114_v45 = vmul.f32 %v1814_v30, %v1829_v33 }
  0x15   :  { %1494 = vmatmul.msk.f32.gmra.mxu0 %vm116_vm0, %v1676_v4 }
  0x19   :  { %1549 = vmatmul.msk.f32.gmra.mxu3 %vm116_vm0, %v93_v16 }
  0x1c   :  { %1536 = vmatmul.msk.f32.gmra.mxu1 %vm116_vm0, %v80_v49 }
  0x1d   :  { %1495 = vmatmul.msk.f32.gmra.mxu0 %vm116_vm0, %v1683_v5 }
  0x21   :  { %1550 = vmatmul.msk.f32.gmra.mxu3 %vm116_vm0, %v94_v19  ;;  %v109_v19 = vmul.f32 %v1739_v15, %v1749_v17 }
  0x24   :  { %1537 = vmatmul.msk.f32.gmra.mxu1 %vm116_vm0, %v81_v53 }
  0x25   :  { %1496 = vmatmul.msk.f32.gmra.mxu0 %vm116_vm0, %v1690_v6 }
  0x29   :  { %1551 = vmatmul.msk.f32.gmra.mxu3 %vm116_vm0, %v95_v22 }
  0x2c   :  { %1538 = vmatmul.msk.f32.gmra.mxu1 %vm116_vm0, %v82_v57 }
  0x2d   :  { %1497 = vmatmul.msk.f32.gmra.mxu0 %vm116_vm0, %v1697_v7 }
  0x31   :  { %1552 = vmatmul.msk.f32.gmra.mxu3 %vm116_vm0, %v96_v25 }
  0x34   :  { %1539 = vmatmul.msk.f32.gmra.mxu1 %vm116_vm0, %v83_v61 }
  0x35   :  { %1498 = vmatmul.msk.f32.gmra.mxu0 %vm116_vm0, %v1704_v8 }
  0x39   :  { %1553 = vmatmul.msk.f32.gmra.mxu3 %vm116_vm0, %v97_v28  ;;  %v86_v28 = vmul.f32 %v36_v43, %v36_v43 }
  0x3b   :  { %1542 = vmatmul.msk.f32.vlgmr.msra.gmra.mxu2 %vm116_vm0, %v86_v28  ;;  %v2110_v28 = vld [vmem:[%s2764_s3 + $0x30] sm:$0xff] }
  0x3d   :  { %1499 = vmatmul.msk.f32.gmra.mxu0 %vm116_vm0, %v1719_v11 }
  0x41   :  { %1554 = vmatmul.msk.f32.gmra.mxu3 %vm116_vm0, %v98_v31 }
  0x45   :  { %1500 = vmatmul.msk.f32.gmra.mxu0 %vm116_vm0, %v1734_v14 }
  0x49   :  { %1555 = vmatmul.msk.f32.gmra.mxu3 %vm116_vm0, %v99_v34 }
  0x4d   :  { %1501 = vmatmul.msk.f32.gmra.mxu0 %vm116_vm0, %v1749_v17 }
  0x51   :  { %1556 = vmatmul.msk.f32.gmra.mxu3 %vm116_vm0, %v100_v37 }
  0x55   :  { %1502 = vmatmul.msk.f32.gmra.mxu0 %vm116_vm0, %v1764_v20 }
  0x59   :  { %1557 = vmatmul.msk.f32.gmra.mxu3 %vm116_vm0, %v101_v40  ;;  %v112_v40 = vmul.f32 %v1784_v24, %v1794_v26 }
  0x5d   :  { %1503 = vmatmul.msk.f32.gmra.mxu0 %vm116_vm0, %v1779_v23 }
  0x61   :  { %1558 = vmatmul.msk.f32.gmra.mxu3 %vm116_vm0, %v102_v44 }
  0x65   :  { %1504 = vmatmul.msk.f32.gmra.mxu0 %vm116_vm0, %v1794_v26  ;;  %v89_v26 = vmul.f32 %v39_v55, %v39_v55 }
  0x69   :  { %1559 = vmatmul.msk.f32.gmra.mxu3 %vm116_vm0, %v103_v48  ;;  %v115_v48 = vmul.f32 %v1824_v32, %v1839_v35 }
  0x6d   :  { %1505 = vmatmul.msk.f32.gmra.mxu0 %vm116_vm0, %v1809_v29 }
  0x71   :  { %1560 = vmatmul.msk.f32.gmra.mxu3 %vm116_vm0, %v104_v52  ;;  %v69_v52 = vmul.f32 %v1669_v3, %v1669_v3 }
  0x75   :  { %1506 = vmatmul.msk.f32.gmra.mxu0 %vm116_vm0, %v1829_v33 }
  0x79   :  { %1561 = vmatmul.msk.f32.gmra.mxu3 %vm116_vm0, %v105_v56 }
  0x7d   :  { %1507 = vmatmul.msk.f32.gmra.mxu0 %vm116_vm0, %v1839_v35  ;;  %v68_v35 = vmul.f32 %v1662_v2, %v1662_v2 }
  0x81   :  { %1562 = vmatmul.msk.f32.gmra.mxu3 %vm116_vm0, %v106_v60  ;;  %v2059_v60 = vld [vmem:[%s2764_s3 + $0x10] sm:$0xff] }
  0x82   :  { %v1851_v38 = vpop.f32.mrf.mxu0 }
  0x85   :  { %1508 = vmatmul.msk.f32.gmra.mxu0 %vm116_vm0, %v1844_v36 }
  0x89   :  { %1563 = vmatmul.msk.f32.gmra.mxu3 %vm116_vm0, %v107_v63 }
  0x8a   :  { %v1866_v42 = vpop.f32.mrf.mxu0 }
  0x8c   :  { %v1928_v0 = vpop.f32.mrf.mxu3 }
  0x8d   :  { %1509 = vmatmul.msk.f32.gmra.mxu0 %vm116_vm0, %v1856_v39 }
  0x91   :  { %1564 = vmatmul.msk.f32.gmra.mxu3 %vm116_vm0, %v108_v10 }
  0x92   :  { %v1878_v46 = vpop.f32.mrf.mxu0 }
  0x94   :  { %v1937_v13 = vpop.f32.mrf.mxu3 }
  0x95   :  { %1510 = vmatmul.msk.f32.gmra.mxu0 %vm116_vm0, %v36_v43  ;;  %v113_v43 = vmul.f32 %v1799_v27, %v1809_v29  ;;  %v84_v29 = vmul.f32 %v1844_v36, %v1844_v36 }
  0x97   :  { %1540 = vmatmul.msk.f32.gmra.mxu1 %vm116_vm0, %v84_v29  ;;  %v2149_v29 = vld [vmem:[%s2764_s3 + $0x58] sm:$0xff] }
  0x99   :  { %1565 = vmatmul.msk.f32.gmra.mxu3 %vm116_vm0, %v109_v19 }
  0x9a   :  { %v1889_v50 = vpop.f32.mrf.mxu0 }
  0x9c   :  { %v1946_v22 = vpop.f32.mrf.mxu3 }
  0x9d   :  { %1511 = vmatmul.msk.f32.gmra.mxu0 %vm116_vm0, %v37_v47 }
  0xa2   :  { %v1900_v54 = vpop.f32.mrf.mxu0 }
  0xa4   :  { %v1953_v31 = vpop.f32.mrf.mxu3 }
  0xa5   :  { %1512 = vmatmul.msk.f32.gmra.mxu0 %vm116_vm0, %v38_v51 }
  0xaa   :  { %v1911_v58 = vpop.f32.mrf.mxu0 }
  0xac   :  { %v1961_v37 = vpop.f32.mrf.mxu3 }
  0xad   :  { %1513 = vmatmul.msk.f32.gmra.mxu0 %vm116_vm0, %v39_v55  ;;  %v70_v55 = vmul.f32 %v1676_v4, %v1676_v4  ;;  %v71_v4 = vmul.f32 %v1683_v5, %v1683_v5  ;;  %v2044_v5 = vld [vmem:[%s2764_s3 + $0x8] sm:$0xff] }
  0xb2   :  { %v1922_v62 = vpop.f32.mrf.mxu0 }
  0xb4   :  { %v1969_v41 = vpop.f32.mrf.mxu3 }
  0xb5   :  { %1514 = vmatmul.msk.f32.gmra.mxu0 %vm116_vm0, %v40_v59 }
  0xba   :  { %v1930_v1 = vpop.f32.mrf.mxu0 }
  0xbc   :  { %v557_v44 = vpop.f32.mrf.mxu3 }
  0xbd   :  { %1515 = vmatmul.msk.f32.gmra.mxu0 %vm116_vm0, %v1709_v9  ;;  %v110_v9 = vmul.f32 %v1754_v18, %v1764_v20  ;;  %v87_v20 = vmul.f32 %v37_v47, %v37_v47  ;;  %v90_v47 = vmul.f32 %v40_v59, %v40_v59 }
  0xbf   :  { %1566 = vmatmul.msk.f32.gmra.mxu3 %vm116_vm0, %v110_v9  ;;  %1543 = vmatmul.msk.f32.gmra.mxu2 %vm116_vm0, %v87_v20 }
  0xc2   :  { %v1939_v16 = vpop.f32.mrf.mxu0 }
  0xc5   :  { %1516 = vmatmul.msk.f32.gmra.mxu0 %vm116_vm0, %v1724_v12  ;;  %v111_v12 = vmul.f32 %v1769_v21, %v1779_v23  ;;  %v88_v23 = vmul.f32 %v38_v51, %v38_v51 }
  0xc7   :  { %1567 = vmatmul.msk.f32.gmra.mxu3 %vm116_vm0, %v111_v12  ;;  %1544 = vmatmul.msk.f32.gmra.mxu2 %vm116_vm0, %v88_v23 }
  0xca   :  { %v401_v25 = vpop.f32.mrf.mxu0 }
  0xcd   :  { %1517 = vmatmul.msk.f32.gmra.mxu0 %vm116_vm0, %v1739_v15 }
  0xcf   :  { %1568 = vmatmul.msk.f32.gmra.mxu3 %vm116_vm0, %v112_v40  ;;  %1545 = vmatmul.msk.f32.gmra.mxu2 %vm116_vm0, %v89_v26 }
  0xd2   :  { %v404_v34 = vpop.f32.mrf.mxu0 }
  0xd5   :  { %1518 = vmatmul.msk.f32.gmra.mxu0 %vm116_vm0, %v1754_v18 }
  0xd7   :  { %1569 = vmatmul.msk.f32.gmra.mxu3 %vm116_vm0, %v113_v43  ;;  %1546 = vmatmul.msk.f32.gmra.mxu2 %vm116_vm0, %v90_v47 }
  0xda   :  { %v407_v15 = vpop.f32.mrf.mxu0 }
  0xdd   :  { %1519 = vmatmul.msk.f32.gmra.mxu0 %vm116_vm0, %v1769_v21 }
  0xdf   :  { %1570 = vmatmul.msk.f32.gmra.mxu3 %vm116_vm0, %v114_v45 }
  0xe2   :  { %v410_v18 = vpop.f32.mrf.mxu0 }
  0xe5   :  { %1520 = vmatmul.msk.f32.gmra.mxu0 %vm116_vm0, %v1784_v24  ;;  %v560_v24 = vpop.f32.mrf.mxu3 }
  0xe7   :  { %1571 = vmatmul.msk.f32.gmra.mxu3 %vm116_vm0, %v115_v48 }
  0xea   :  { %v413_v21 = vpop.f32.mrf.mxu0 }
  0xed   :  { %1521 = vmatmul.msk.f32.gmra.mxu0 %vm116_vm0, %v1799_v27  ;;  %v85_v27 = vmul.f32 %v1856_v39, %v1856_v39  ;;  %v563_v33 = vpop.f32.mrf.mxu3  ;;  %v500_v39 = vpop.f32.mrf.mxu1 }
  0xef   :  { %1541 = vmatmul.msk.f32.gmra.mxu1 %vm116_vm0, %v85_v27  ;;  %v2155_v27 = vld [vmem:[%s2764_s3 + $0x60] sm:$0xff] }
  0xf2   :  { %v416_v49 = vpop.f32.mrf.mxu0 }
  0xf5   :  { %1522 = vmatmul.msk.f32.gmra.mxu0 %vm116_vm0, %v1814_v30  ;;  %v2001_v36 = vpop.f32.mrf.mxu3  ;;  %v503_v53 = vpop.f32.mrf.mxu1 }
  0xfa   :  { %v419_v51 = vpop.f32.mrf.mxu0 }
  0xfb   :  { %614 = vmatpush.msrb.mxu1 %v419_v51 }
  0xfd   :  { %1523 = vmatmul.msk.f32.gmra.mxu0 %vm116_vm0, %v1824_v32  ;;  %615 = vmatpush.msrb.mxu1 %v416_v49  ;;  %v2010_v2 = vpop.f32.mrf.mxu3  ;;  %v506_v56 = vpop.f32.mrf.mxu1 }
  0xff   :  { %616 = vmatpush.msrb.mxu1 %v413_v21 }
 0x101   :  { %617 = vmatpush.msrb.mxu1 %v410_v18 }
 0x102   :  { %v1999_v30 = vpop.f32.mrf.mxu0 }
 0x103   :  { %618 = vmatpush.msrb.mxu1 %v407_v15 }
 0x105   :  { %1524 = vmatmul.msk.f32.gmra.mxu0 %vm116_vm0, %v68_v35  ;;  %619 = vmatpush.msrb.mxu1 %v404_v34  ;;  %v2023_v57 = vpop.f32.mrf.mxu3 }
 0x107   :  { %620 = vmatpush.msrb.mxu1 %v401_v25  ;;  %v76_v25 = vmul.f32 %v1734_v14, %v1734_v14  ;;  %v2119_v14 = vld [vmem:[%s2764_s3 + $0x38] sm:$0xff] }
 0x109   :  { %621 = vmatpush.msrb.mxu1 %v1939_v16 }
 0x10a   :  { %v2007_v32 = vpop.f32.mrf.mxu0 }
 0x10b   :  { %622 = vmatpush.msrb.mxu1 %v1930_v1  ;;  %v2073_v1 = vld [vmem:[%s2764_s3 + $0x18] sm:$0xff] }
 0x10d   :  { %1525 = vmatmul.msk.f32.gmra.mxu0 %vm116_vm0, %v69_v52  ;;  %623 = vmatpush.msrb.mxu1 %v1922_v62 }
 0x10f   :  { %624 = vmatpush.msrb.mxu1 %v1911_v58  ;;  %v2029_v58 = vld [vmem:[%s2764_s3] sm:$0xff] }
 0x111   :  { %625 = vmatpush.msrb.mxu1 %v1900_v54 }
 0x112   :  { %v2018_v3 = vpop.f32.mrf.mxu0 }
 0x113   :  { %626 = vmatpush.msrb.mxu1 %v1889_v50 }
 0x115   :  { %1526 = vmatmul.msk.f32.gmra.mxu0 %vm116_vm0, %v70_v55  ;;  %627 = vmatpush.msrb.mxu1 %v1878_v46  ;;  %v509_v46 = vpop.f32.mrf.mxu1  ;;  %v2169_v55 = vld [vmem:[%s2764_s3 + $0x70] sm:$0xff] }
 0x117   :  { %628 = vmatpush.msrb.mxu1 %v1866_v42  ;;  %v2039_v42 = vpop.f32.mrf.mxu3 }
 0x119   :  { %629 = vmatpush.msrb.mxu1 %v1851_v38  ;;  %v72_v38 = vmul.f32 %v1690_v6, %v1690_v6  ;;  %v73_v6 = vmul.f32 %v1697_v7, %v1697_v7  ;;  %v74_v7 = vmul.f32 %v1704_v8, %v1704_v8  ;;  %v75_v8 = vmul.f32 %v1719_v11, %v1719_v11 }
 0x11a   :  { %v2034_v50 = vpop.f32.mrf.mxu0  ;;  %630 = vmatmul.f32.vlgmr.msrb.gmra.mxu1 %v2029_v58 }
 0x11b   :  { %809 = vmatpush.msra.mxu1 %v563_v33 }
 0x11d   :  { %810 = vmatpush.msra.mxu1 %v560_v24  ;;  %1527 = vmatmul.msk.f32.gmra.mxu0 %vm116_vm0, %v71_v4  ;;  %v512_v59 = vpop.f32.mrf.mxu1 }
 0x11f   :  { %811 = vmatpush.msra.mxu1 %v557_v44  ;;  %v2066_v62 = vpop.f32.mrf.mxu3  ;;  %v2143_v44 = vld [vmem:[%s2764_s3 + $0x50] sm:$0xff] }
 0x121   :  { %812 = vmatpush.msra.mxu1 %v1969_v41  ;;  %v2135_v41 = vld [vmem:[%s2764_s3 + $0x48] sm:$0xff] }
 0x122   :  { %v2048_v54 = vpop.f32.mrf.mxu0  ;;  %633 = vmatmul.f32.gmra.mxu1 %v2044_v5 }
 0x123   :  { %813 = vmatpush.msra.mxu1 %v1961_v37  ;;  %v524_v37 = vpop.f32.mrf.mxu2 }
 0x125   :  { %814 = vmatpush.msra.mxu1 %v1953_v31  ;;  %1528 = vmatmul.msk.f32.gmra.mxu0 %vm116_vm0, %v72_v38  ;;  %v515_v63 = vpop.f32.mrf.mxu1  ;;  %v77_v31 = vmul.f32 %v1749_v17, %v1749_v17  ;;  %v2127_v17 = vld [vmem:[%s2764_s3 + $0x40] sm:$0xff] }
 0x126   :  { %744 = vmatpush.msrb.mxu3 %v515_v63 }
 0x127   :  { %815 = vmatpush.msra.mxu1 %v1946_v22  ;;  %v2099_v22 = vld [vmem:[%s2764_s3 + $0x28] sm:$0xff] }
 0x128   :  { %745 = vmatpush.msrb.mxu3 %v512_v59 }
 0x129   :  { %816 = vmatpush.msra.mxu1 %v1937_v13  ;;  %v2086_v13 = vld [vmem:[%s2764_s3 + $0x20] sm:$0xff] }
 0x12a   :  { %v2063_v61 = vpop.f32.mrf.mxu0  ;;  %636 = vmatmul.f32.gmra.mxu1 %v2059_v60  ;;  %746 = vmatpush.msrb.mxu3 %v509_v46  ;;  %v2180_v46 = vld [vmem:[%s2764_s3 + $0x78] sm:$0xff] }
 0x12b   :  { %817 = vmatpush.msra.mxu1 %v1928_v0  ;;  %v2080_v0 = vpop.f32.mrf.mxu3 }
 0x12c   :  { %747 = vmatpush.msrb.mxu3 %v506_v56 }
 0x12d   :  { %1529 = vmatmul.msk.f32.gmra.mxu0 %vm116_vm0, %v73_v6  ;;  %v518_v48 = vpop.f32.mrf.mxu1 }
 0x12e   :  { %748 = vmatpush.msrb.mxu3 %v503_v53 }
 0x130   :  { %749 = vmatpush.msrb.mxu3 %v500_v39  ;;  %v2161_v39 = vld [vmem:[%s2764_s3 + $0x68] sm:$0xff] }
 0x132   :  { %v2077_v10 = vpop.f32.mrf.mxu0  ;;  %639 = vmatmul.f32.gmra.mxu1 %v2073_v1 }
 0x133   :  { %v2094_v19 = vpop.f32.mrf.mxu3 }
 0x135   :  { %1530 = vmatmul.msk.f32.gmra.mxu0 %vm116_vm0, %v74_v7 }
 0x13a   :  { %v2090_v16 = vpop.f32.mrf.mxu0  ;;  %642 = vmatmul.f32.gmra.mxu1 %v2086_v13 }
 0x13b   :  { %v2105_v11 = vpop.f32.mrf.mxu3 }
 0x13d   :  { %1531 = vmatmul.msk.f32.gmra.mxu0 %vm116_vm0, %v75_v8 }
 0x142   :  { %v446_v9 = vpop.f32.mrf.mxu0  ;;  %645 = vmatmul.f32.gmra.mxu1 %v2099_v22  ;;  %v527_v23 = vpop.f32.mrf.mxu2 }
 0x143   :  { %v2121_v20 = vpop.f32.mrf.mxu3 }
 0x145   :  { %1532 = vmatmul.msk.f32.gmra.mxu0 %vm116_vm0, %v76_v25 }
 0x14a   :  { %v449_v34 = vpop.f32.mrf.mxu0  ;;  %648 = vmatmul.f32.gmra.mxu1 %v2110_v28  ;;  %v530_v43 = vpop.f32.mrf.mxu2 }
 0x14b   :  { %v2130_v40 = vpop.f32.mrf.mxu3 }
 0x14d   :  { %1533 = vmatmul.msk.f32.gmra.mxu0 %vm116_vm0, %v77_v31 }
 0x152   :  { %v452_v12 = vpop.f32.mrf.mxu0  ;;  %651 = vmatmul.f32.gmra.mxu1 %v2119_v14  ;;  %v533_v45 = vpop.f32.mrf.mxu2 }
 0x153   :  { %v2138_v26 = vpop.f32.mrf.mxu3 }
 0x15a   :  { %v455_v15 = vpop.f32.mrf.mxu0  ;;  %654 = vmatmul.f32.gmra.mxu1 %v2127_v17  ;;  %v536_v49 = vpop.f32.mrf.mxu2 }
 0x15b   :  { %v599_v47 = vpop.f32.mrf.mxu3  ;;  %818 = vmatpush.msra.mxu1 %v536_v49 }
 0x15d   :  { %819 = vmatpush.msra.mxu1 %v533_v45 }
 0x15f   :  { %820 = vmatpush.msra.mxu1 %v530_v43 }
 0x161   :  { %821 = vmatpush.msra.mxu1 %v527_v23 }
 0x162   :  { %v458_v18 = vpop.f32.mrf.mxu0  ;;  %657 = vmatmul.f32.gmra.mxu1 %v2135_v41 }
 0x163   :  { %v602_v51 = vpop.f32.mrf.mxu3  ;;  %822 = vmatpush.msra.mxu1 %v524_v37 }
 0x16a   :  { %v461_v21 = vpop.f32.mrf.mxu0  ;;  %660 = vmatmul.f32.gmra.mxu1 %v2143_v44 }
 0x16b   :  { %v605_v53 = vpop.f32.mrf.mxu3 }
 0x16c   :  { %v521_v35 = vpop.f32.mrf.mxu1 }
 0x16d   :  { %823 = vmatpush.msra.mxu1 %v521_v35 }
 0x16f   :  { %824 = vmatpush.msra.mxu1 %v518_v48 }
 0x172   :  { %v464_v24 = vpop.f32.mrf.mxu0  ;;  %663 = vmatmul.f32.gmra.mxu1 %v2149_v29 }
 0x173   :  { %v608_v4 = vpop.f32.mrf.mxu3 }
 0x17a   :  { %v467_v33 = vpop.f32.mrf.mxu0  ;;  %666 = vmatmul.f32.gmra.mxu1 %v2155_v27 }
 0x17b   :  { %679 = vmatpush.msrb.mxu2 %v467_v33  ;;  %v611_v59 = vpop.f32.mrf.mxu3 }
 0x17d   :  { %680 = vmatpush.msrb.mxu2 %v464_v24 }
 0x17f   :  { %681 = vmatpush.msrb.mxu2 %v461_v21 }
 0x181   :  { %682 = vmatpush.msrb.mxu2 %v458_v18 }
 0x182   :  { %v2163_v52 = vpop.f32.mrf.mxu0  ;;  %669 = vmatmul.f32.gmra.mxu1 %v2161_v39 }
 0x183   :  { %683 = vmatpush.msrb.mxu2 %v455_v15 }
 0x185   :  { %684 = vmatpush.msrb.mxu2 %v452_v12 }
 0x187   :  { %685 = vmatpush.msrb.mxu2 %v449_v34 }
 0x189   :  { %686 = vmatpush.msrb.mxu2 %v446_v9 }
 0x18a   :  { %v2171_v56 = vpop.f32.mrf.mxu0  ;;  %672 = vmatmul.f32.gmra.mxu1 %v2169_v55 }
 0x18b   :  { %687 = vmatpush.msrb.mxu2 %v2090_v16 }
 0x18d   :  { %688 = vmatpush.msrb.mxu2 %v2077_v10 }
 0x18f   :  { %689 = vmatpush.msrb.mxu2 %v2063_v61 }
 0x191   :  { %690 = vmatpush.msrb.mxu2 %v2048_v54 }
 0x192   :  { %v476_v38 = vpop.f32.mrf.mxu0  ;;  %675 = vmatmul.f32.gmra.mxu1 %v2180_v46 }
 0x193   :  { %691 = vmatpush.msrb.mxu2 %v2034_v50 }
 0x195   :  { %692 = vmatpush.msrb.mxu2 %v2018_v3 }
 0x197   :  { %693 = vmatpush.msrb.mxu2 %v2007_v32  ;;  %v2187_v6 = vpop.f32.mrf.mxu1 }
 0x199   :  { %694 = vmatpush.msrb.mxu2 %v1999_v30 }
 0x19a   :  { %v479_v61 = vpop.f32.mrf.mxu0  ;;  %695 = vmatmul.f32.vlgmr.msrb.gmra.mxu2 %v2029_v58  ;;  %825 = vmatmul.f32.vlgmr.msra.gmra.mxu1 %v2029_v58 }
 0x19b   :  { %874 = vmatpush.msra.mxu2 %v611_v59 }
 0x19d   :  { %875 = vmatpush.msra.mxu2 %v608_v4 }
 0x19f   :  { %876 = vmatpush.msra.mxu2 %v605_v53  ;;  %v2192_v50 = vpop.f32.mrf.mxu1 }
 0x1a1   :  { %877 = vmatpush.msra.mxu2 %v602_v51 }
 0x1a2   :  { %v482_v54 = vpop.f32.mrf.mxu0  ;;  %698 = vmatmul.f32.gmra.mxu2 %v2044_v5  ;;  %828 = vmatmul.f32.gmra.mxu1 %v2044_v5 }
 0x1a3   :  { %878 = vmatpush.msra.mxu2 %v599_v47 }
 0x1a5   :  { %879 = vmatpush.msra.mxu2 %v2138_v26 }
 0x1a7   :  { %880 = vmatpush.msra.mxu2 %v2130_v40  ;;  %v2198_v30 = vpop.f32.mrf.mxu1 }
 0x1a9   :  { %881 = vmatpush.msra.mxu2 %v2121_v20 }
 0x1aa   :  { %v485_v32 = vpop.f32.mrf.mxu0  ;;  %701 = vmatmul.f32.gmra.mxu2 %v2059_v60  ;;  %831 = vmatmul.f32.gmra.mxu1 %v2059_v60 }
 0x1ab   :  { %882 = vmatpush.msra.mxu2 %v2105_v11 }
 0x1ad   :  { %883 = vmatpush.msra.mxu2 %v2094_v19 }
 0x1af   :  { %884 = vmatpush.msra.mxu2 %v2080_v0  ;;  %v2206_v3 = vpop.f32.mrf.mxu1 }
 0x1b1   :  { %885 = vmatpush.msra.mxu2 %v2066_v62 }
 0x1b2   :  { %v488_v63 = vpop.f32.mrf.mxu0  ;;  %704 = vmatmul.f32.gmra.mxu2 %v2073_v1  ;;  %834 = vmatmul.f32.gmra.mxu1 %v2073_v1 }
 0x1b3   :  { %886 = vmatpush.msra.mxu2 %v2039_v42 }
 0x1b5   :  { %887 = vmatpush.msra.mxu2 %v2023_v57 }
 0x1b7   :  { %888 = vmatpush.msra.mxu2 %v2010_v2  ;;  %v2214_v7 = vpop.f32.mrf.mxu1 }
 0x1b9   :  { %889 = vmatpush.msra.mxu2 %v2001_v36 }
 0x1ba   :  { %v491_v10 = vpop.f32.mrf.mxu0  ;;  %707 = vmatmul.f32.gmra.mxu2 %v2086_v13  ;;  %837 = vmatmul.f32.gmra.mxu1 %v2086_v13 }
 0x1bf   :  { %v2219_v62 = vpop.f32.mrf.mxu1 }
 0x1c2   :  { %v494_v0 = vpop.f32.mrf.mxu0  ;;  %710 = vmatmul.f32.gmra.mxu2 %v2099_v22  ;;  %840 = vmatmul.f32.gmra.mxu1 %v2099_v22 }
 0x1c7   :  { %v2223_v42 = vpop.f32.mrf.mxu1 }
 0x1ca   :  { %v497_v57 = vpop.f32.mrf.mxu0  ;;  %713 = vmatmul.f32.gmra.mxu2 %v2110_v28  ;;  %843 = vmatmul.f32.gmra.mxu1 %v2110_v28 }
 0x1cb   :  { %750 = vmatpush.msrb.mxu3 %v497_v57 }
 0x1cd   :  { %751 = vmatpush.msrb.mxu3 %v494_v0 }
 0x1cf   :  { %752 = vmatpush.msrb.mxu3 %v491_v10  ;;  %v2227_v36 = vpop.f32.mrf.mxu1 }
 0x1d1   :  { %753 = vmatpush.msrb.mxu3 %v488_v63 }
 0x1d2   :  { %716 = vmatmul.f32.gmra.mxu2 %v2119_v14  ;;  %846 = vmatmul.f32.gmra.mxu1 %v2119_v14 }
 0x1d3   :  { %754 = vmatpush.msrb.mxu3 %v485_v32 }
 0x1d5   :  { %755 = vmatpush.msrb.mxu3 %v482_v54 }
 0x1d7   :  { %756 = vmatpush.msrb.mxu3 %v479_v61  ;;  %v2231_v2 = vpop.f32.mrf.mxu1 }
 0x1d9   :  { %757 = vmatpush.msrb.mxu3 %v476_v38 }
 0x1da   :  { %719 = vmatmul.f32.gmra.mxu2 %v2127_v17  ;;  %849 = vmatmul.f32.gmra.mxu1 %v2127_v17 }
 0x1db   :  { %758 = vmatpush.msrb.mxu3 %v2171_v56 }
 0x1dd   :  { %759 = vmatpush.msrb.mxu3 %v2163_v52 }
 0x1de   :  { %760 = vmatmul.f32.vlgmr.msrb.gmra.mxu3 %v2029_v58 }
 0x1df   :  { %v2238_v8 = vpop.f32.mrf.mxu1 }
 0x1e2   :  { %722 = vmatmul.f32.gmra.mxu2 %v2135_v41  ;;  %852 = vmatmul.f32.gmra.mxu1 %v2135_v41 }
 0x1e6   :  { %763 = vmatmul.f32.gmra.mxu3 %v2044_v5 }
 0x1e7   :  { %v2243_v16 = vpop.f32.mrf.mxu1 }
 0x1ea   :  { %725 = vmatmul.f32.gmra.mxu2 %v2143_v44  ;;  %855 = vmatmul.f32.gmra.mxu1 %v2143_v44 }
 0x1ee   :  { %766 = vmatmul.f32.gmra.mxu3 %v2059_v60 }
 0x1ef   :  { %v2248_v19 = vpop.f32.mrf.mxu1 }
 0x1f2   :  { %728 = vmatmul.f32.gmra.mxu2 %v2149_v29  ;;  %858 = vmatmul.f32.gmra.mxu1 %v2149_v29 }
 0x1f6   :  { %769 = vmatmul.f32.gmra.mxu3 %v2073_v1 }
 0x1f7   :  { %v2253_v25 = vpop.f32.mrf.mxu1 }
 0x1fa   :  { %731 = vmatmul.f32.gmra.mxu2 %v2155_v27  ;;  %861 = vmatmul.f32.gmra.mxu1 %v2155_v27 }
 0x1fe   :  { %772 = vmatmul.f32.gmra.mxu3 %v2086_v13 }
 0x1ff   :  { %v2258_v9 = vpop.f32.mrf.mxu1 }
 0x202   :  { %734 = vmatmul.f32.gmra.mxu2 %v2161_v39  ;;  %864 = vmatmul.f32.gmra.mxu1 %v2161_v39 }
 0x206   :  { %775 = vmatmul.f32.gmra.mxu3 %v2099_v22 }
 0x207   :  { %v2263_v11 = vpop.f32.mrf.mxu1 }
 0x20a   :  { %737 = vmatmul.f32.gmra.mxu2 %v2169_v55  ;;  %867 = vmatmul.f32.gmra.mxu1 %v2169_v55 }
 0x20e   :  { %778 = vmatmul.f32.gmra.mxu3 %v2110_v28 }
 0x20f   :  { %v2268_v31 = vpop.f32.mrf.mxu1 }
 0x212   :  { %740 = vmatmul.f32.gmra.mxu2 %v2180_v46  ;;  %870 = vmatmul.f32.gmra.mxu1 %v2180_v46 }
 0x216   :  { %781 = vmatmul.f32.gmra.mxu3 %v2119_v14 }
 0x217   :  { %v826_v34 = vpop.f32.mrf.mxu1 }
 0x21a   :  { %890 = vmatmul.f32.vlgmr.msra.gmra.mxu2 %v2029_v58 }
 0x21d   :  { %v2274_v12 = vpop.f32.mrf.mxu2 }
 0x21e   :  { %784 = vmatmul.f32.gmra.mxu3 %v2127_v17  ;;  %v955_v20 = vmul.f32 %v2274_v12, %v2274_v12 }
 0x21f   :  { %v829_v15 = vpop.f32.mrf.mxu1 }
 0x220   :  { %v1003_v37 = vsub.f32 %v826_v34, %v955_v20  ;;  %v941_v34 = vmul.f32 %v2198_v30, %v2198_v30 }
 0x222   :  { %893 = vmatmul.f32.gmra.mxu2 %v2044_v5 }
 0x225   :  { %v2280_v40 = vpop.f32.mrf.mxu2 }
 0x226   :  { %787 = vmatmul.f32.gmra.mxu3 %v2135_v41  ;;  %v956_v23 = vmul.f32 %v2280_v40, %v2280_v40 }
 0x227   :  { %v832_v58 = vpop.f32.mrf.mxu1 }
 0x228   :  { %v1004_v18 = vsub.f32 %v829_v15, %v956_v23 }
 0x22a   :  { %896 = vmatmul.f32.gmra.mxu2 %v2059_v60 }
 0x22d   :  { %v2286_v43 = vpop.f32.mrf.mxu2 }
 0x22e   :  { %790 = vmatmul.f32.gmra.mxu3 %v2143_v44  ;;  %v957_v26 = vmul.f32 %v2286_v43, %v2286_v43 }
 0x22f   :  { %v835_v5 = vpop.f32.mrf.mxu1 }
 0x230   :  { %v1005_v21 = vsub.f32 %v832_v58, %v957_v26  ;;  %v1117_v15 = vadd.f32 %v957_v26, %v941_v34 }
 0x232   :  { %899 = vmatmul.f32.gmra.mxu2 %v2073_v1 }
 0x235   :  { %v2292_v45 = vpop.f32.mrf.mxu2 }
 0x236   :  { %793 = vmatmul.f32.gmra.mxu3 %v2149_v29  ;;  %v958_v47 = vmul.f32 %v2292_v45, %v2292_v45 }
 0x237   :  { %v838_v48 = vpop.f32.mrf.mxu1 }
 0x238   :  { %v1006_v24 = vsub.f32 %v835_v5, %v958_v47 }
 0x23a   :  { %902 = vmatmul.f32.gmra.mxu2 %v2086_v13 }
 0x23d   :  { %v2298_v60 = vpop.f32.mrf.mxu2 }
 0x23e   :  { %796 = vmatmul.f32.gmra.mxu3 %v2155_v27  ;;  %v959_v49 = vmul.f32 %v2298_v60, %v2298_v60 }
 0x240   :  { %v1007_v1 = vsub.f32 %v838_v48, %v959_v49  ;;  %v942_v48 = vmul.f32 %v2206_v3, %v2206_v3 }
 0x242   :  { %905 = vmatmul.f32.gmra.mxu2 %v2099_v22  ;;  %v939_v22 = vmul.f32 %v2187_v6, %v2187_v6 }
 0x245   :  { %v2304_v33 = vpop.f32.mrf.mxu2 }
 0x246   :  { %799 = vmatmul.f32.gmra.mxu3 %v2161_v39 }
 0x24a   :  { %908 = vmatmul.f32.gmra.mxu2 %v2110_v28  ;;  %v1115_v28 = vadd.f32 %v955_v20, %v939_v22 }
 0x24d   :  { %v2308_v51 = vpop.f32.mrf.mxu2 }
 0x24e   :  { %802 = vmatmul.f32.gmra.mxu3 %v2169_v55 }
 0x252   :  { %911 = vmatmul.f32.gmra.mxu2 %v2119_v14  ;;  %v1131_v14 = vadd.f32 0.0001, %v1115_v28 }
 0x255   :  { %v2312_v13 = vpop.f32.mrf.mxu2 }
 0x256   :  { %805 = vmatmul.f32.gmra.mxu3 %v2180_v46 }
 0x25a   :  { %914 = vmatmul.f32.gmra.mxu2 %v2127_v17  ;;  %v940_v17 = vmul.f32 %v2192_v50, %v2192_v50 }
 0x25c   :  { %v1116_v32 = vadd.f32 %v956_v23, %v940_v17  ;;  %v1133_v23 = vadd.f32 0.0001, %v1117_v15 }
 0x25d   :  { %v2316_v35 = vpop.f32.mrf.mxu2 }
 0x25e   :  { %v1132_v0 = vadd.f32 0.0001, %v1116_v32 }
 0x261   :  { %v761_v52 = vpop.f32.mrf.mxu3 }
 0x262   :  { %v987_v53 = vsub.f32 %v761_v52, %v939_v22  ;;  %917 = vmatmul.f32.gmra.mxu2 %v2135_v41 }
 0x264   :  { %v1147_v56 = vadd.f32 %v1003_v37, %v987_v53  ;;  %v1118_v53 = vadd.f32 %v958_v47, %v942_v48 }
 0x265   :  { %v2321_v4 = vpop.f32.mrf.mxu2 }
 0x266   :  { %v1163_v38 = vadd.f32 0.0009, %v1147_v56  ;;  %v1134_v26 = vadd.f32 0.0001, %v1118_v53 }
 0x268   :  { %v2323_v59 = vmul.f32 %v1163_v38, %v1131_v14  ;;  %v943_v14 = vmul.f32 %v2214_v7, %v2214_v7 }
 0x269   :  { %v764_v61 = vpop.f32.mrf.mxu3 }
 0x26a   :  { %v988_v54 = vsub.f32 %v764_v61, %v940_v17  ;;  %920 = vmatmul.f32.gmra.mxu2 %v2143_v44  ;;  %v1119_v61 = vadd.f32 %v959_v49, %v943_v14  ;;  %1581 = vrcp.f32 %v2323_v59  ;;  %vm1200_vm2 = vweird.f32 %v2323_v59 }
 0x26c   :  { %v1148_v63 = vadd.f32 %v1004_v18, %v988_v54  ;;  %v1135_v47 = vadd.f32 0.0001, %v1119_v61 }
 0x26d   :  { %v2328_v10 = vpop.f32.mrf.mxu2 }
 0x26e   :  { %v1164_v41 = vadd.f32 0.0009, %v1148_v63 }
 0x270   :  { %v2330_v57 = vmul.f32 %v1164_v41, %v1132_v0  ;;  %v841_v0 = vpop.f32.mrf.mxu1 }
 0x271   :  { %v767_v20 = vpop.f32.mrf.mxu3 }
 0x272   :  { %v989_v37 = vsub.f32 %v767_v20, %v941_v34  ;;  %923 = vmatmul.f32.gmra.mxu2 %v2149_v29  ;;  %v1582_v34 = vpop.eup %1581  ;;  %1583 = vrcp.f32 %v2330_v57  ;;  %vm1215_vm6 = vweird.f32 %v2330_v57 }
 0x273   :  { %vm1201_vm1 = vweird.f32 %v1582_v34 }
 0x274   :  { %v1149_v58 = vadd.f32 %v1005_v21, %v989_v37  ;;  %vm1202_vm3 = vmor %vm1200_vm2, %vm1201_vm1 }
 0x275   :  { %v2335_v5 = vpop.f32.mrf.mxu2 }
 0x276   :  { %v1165_v44 = vadd.f32 0.0009, %v1149_v58 }
 0x278   :  { %v2337_v18 = vmul.f32 %v1165_v44, %v1133_v23  ;;  %v2364_v20 = vpop.f32.mrf.mxu1  ;;  %v2366_v15 = vpop.eup %1583 }
 0x279   :  { %v770_v22 = vpop.f32.mrf.mxu3  ;;  %v1211_v58 = vmul.f32 %v2366_v15, %v2330_v57  ;;  %vm1216_vm5 = vweird.f32 %v2366_v15 }
 0x27a   :  { %v990_v52 = vsub.f32 %v770_v22, %v942_v48  ;;  %926 = vmatmul.f32.gmra.mxu2 %v2155_v27  ;;  %1585 = vrcp.f32 %v2337_v18  ;;  %vm2415_vm7 = vmor %vm1215_vm6, %vm1216_vm5  ;;  %vm1230_vm10 = vweird.f32 %v2337_v18 }
 0x27b   :  { %v1212_v53 = vsub.f32 1.0, %v1211_v58 }
 0x27c   :  { %v1150_v28 = vadd.f32 %v1006_v24, %v990_v52 }
 0x27d   :  { %v2342_v56 = vpop.f32.mrf.mxu2 }
 0x27e   :  { %v1166_v29 = vadd.f32 0.0009, %v1150_v28 }
 0x280   :  { %v2344_v21 = vmul.f32 %v1166_v29, %v1134_v26  ;;  %v2375_v28 = vpop.eup %1585  ;;  %v960_v26 = vmul.f32 %v2304_v33, %v2304_v33  ;;  %v2382_v29 = vpop.f32.mrf.mxu1 }
 0x281   :  { %v773_v38 = vpop.f32.mrf.mxu3  ;;  %vm1231_vm9 = vweird.f32 %v2375_v28 }
 0x282   :  { %v991_v17 = vsub.f32 %v773_v38, %v943_v14  ;;  %929 = vmatmul.f32.gmra.mxu2 %v2161_v39  ;;  %v1196_v39 = vmul.f32 %v1582_v34, %v2323_v59  ;;  %v1204_v38 = vand.u32 2147483647, %v2323_v59  ;;  %1587 = vrcp.f32 %v2344_v21  ;;  %vm2448_vm11 = vmor %vm1230_vm10, %vm1231_vm9 }
 0x283   :  { %vm1245_vm14 = vweird.f32 %v2344_v21 }
 0x284   :  { %v1151_v54 = vadd.f32 %v1007_v1, %v991_v17  ;;  %v1197_v37 = vsub.f32 1.0, %v1196_v39  ;;  %vm1205_vm4 = vcmp.eq.f32.partialorder %v1204_v38, 8.507059e+37 }
 0x285   :  { %v2349_v32 = vpop.f32.mrf.mxu2 }
 0x286   :  { %v1167_v27 = vadd.f32 0.0009, %v1151_v54  ;;  %v1198_v23 = vmul.f32 %v1582_v34, %v1197_v37  ;;  %v972_v54 = vmul.f32 %v2280_v40, %v2192_v50  ;;  %v1213_v37 = vmul.f32 %v2366_v15, %v1212_v53 }
 0x288   :  { %v2351_v24 = vmul.f32 %v1167_v27, %v1135_v47  ;;  %v1199_v52 = vadd.f32 %v1582_v34, %v1198_v23  ;;  %v1226_v47 = vmul.f32 %v2375_v28, %v2337_v18  ;;  %v1036_v40 = vmul.f32 2.0, %v972_v54  ;;  %v2398_v53 = vpop.eup %1587 }
 0x289   :  { %v776_v63 = vpop.f32.mrf.mxu3  ;;  %vm1246_vm13 = vweird.f32 %v2398_v53 }
 0x28a   :  { %932 = vmatmul.f32.gmra.mxu2 %v2169_v55  ;;  %v971_v55 = vmul.f32 %v2274_v12, %v2187_v6  ;;  %v944_v6 = vmul.f32 %v2219_v62, %v2219_v62  ;;  %v1206_v12 = vand.u32 2147483648, %v2323_v59  ;;  %v1203_v39 = vsel %vm1202_vm3, %v1582_v34, %v1199_v52  ;;  %vm2484_vm15 = vmor %vm1245_vm14, %vm1246_vm13 }
 0x28b   :  { %v973_v59 = vmul.f32 %v2286_v43, %v2198_v30  ;;  %v1214_v52 = vadd.f32 %v2366_v15, %v1213_v37  ;;  %v961_v30 = vmul.f32 %v2308_v51, %v2308_v51  ;;  %v1221_v43 = vand.u32 2147483648, %v2330_v57 }
 0x28c   :  { %v992_v17 = vsub.f32 %v776_v63, %v944_v6  ;;  %v1207_v58 = vor.u32 1.1754944e-38, %v1206_v12  ;;  %v945_v63 = vmul.f32 %v2223_v42, %v2223_v42  ;;  %v1120_v12 = vadd.f32 %v960_v26, %v944_v6 }
 0x28d   :  { %v2355_v41 = vpop.f32.mrf.mxu2  ;;  %1589 = vrcp.f32 %v2351_v24  ;;  %vm1260_vm3 = vweird.f32 %v2351_v24 }
 0x291   :  { %v2360_v49 = vpop.f32.mrf.mxu3 }
 0x292   :  { %935 = vmatmul.f32.gmra.mxu2 %v2180_v46  ;;  %v1035_v46 = vmul.f32 2.0, %v971_v55  ;;  %v993_v6 = vsub.f32 %v2360_v49, %v945_v63  ;;  %v1136_v49 = vadd.f32 0.0001, %v1120_v12 }
 0x293   :  { %v2435_v12 = vpop.eup %1589 }
 0x294   :  { %v1051_v61 = vadd.f32 0.0001, %v1035_v46  ;;  %v1208_v46 = vsel %vm1205_vm4, %v1207_v58, %v1203_v39  ;;  %v1241_v39 = vmul.f32 %v2398_v53, %v2344_v21  ;;  %v946_v58 = vmul.f32 %v2227_v36, %v2227_v36 }
 0x295   :  { %v2362_v1 = vpop.f32.mrf.mxu2  ;;  %vm1261_vm2 = vweird.f32 %v2435_v12 }
 0x296   :  { %vm2519_vm4 = vmor %vm1260_vm3, %vm1261_vm2 }
 0x299   :  { %v2373_v48 = vpop.f32.mrf.mxu3 }
 0x29d   :  { %v891_v44 = vpop.f32.mrf.mxu2 }
 0x29e   :  { %v1019_v22 = vsub.f32 %v891_v44, %v971_v55  ;;  %v1008_v55 = vsub.f32 %v841_v0, %v960_v26  ;;  %v1227_v0 = vsub.f32 1.0, %v1226_v47  ;;  %v1052_v47 = vadd.f32 0.0001, %v1036_v40 }
 0x2a0   :  { %v1067_v14 = vmul.f32 2.0, %v1019_v22  ;;  %v1152_v44 = vadd.f32 %v1008_v55, %v992_v17  ;;  %v1009_v55 = vsub.f32 %v2364_v20, %v961_v30 }
 0x2a1   :  { %v2403_v38 = vpop.f32.mrf.mxu3 }
 0x2a2   :  { %v1083_v27 = vadd.f32 0.0009, %v1067_v14  ;;  %v1037_v14 = vmul.f32 2.0, %v973_v59  ;;  %v1168_v26 = vadd.f32 0.0009, %v1152_v44 }
 0x2a4   :  { %v1099_v23 = vmul.f32 %v1083_v27, %v1051_v61  ;;  %v1219_v61 = vand.u32 2147483647, %v2330_v57  ;;  %v2421_v57 = vpop.f32.mrf.mxu1  ;;  %v2431_v40 = vmul.f32 %v1168_v26, %v1136_v49 }
 0x2a5   :  { %v894_v50 = vpop.f32.mrf.mxu2 }
 0x2a6   :  { %v1209_v22 = vmul.f32 %v1208_v46, %v1099_v23  ;;  %v1020_v34 = vsub.f32 %v894_v50, %v972_v54  ;;  %v2409_v54 = vmul.f32 %v2292_v45, %v2206_v3  ;;  %v1218_v3 = vsel %vm2415_vm7, %v2366_v15, %v1214_v52 }
 0x2a7   :  { %v1228_v45 = vmul.f32 %v2375_v28, %v1227_v0  ;;  %v1222_v23 = vor.u32 1.1754944e-38, %v1221_v43  ;;  %vm1220_vm8 = vcmp.eq.f32.partialorder %v1219_v61, 8.507059e+37  ;;  %v1053_v46 = vadd.f32 0.0001, %v1037_v14 }
 0x2a8   :  { %v1068_v17 = vmul.f32 2.0, %v1020_v34  ;;  %v1038_v50 = vmul.f32 2.0, %v2409_v54  ;;  %v1153_v34 = vadd.f32 %v1009_v55, %v993_v6  ;;  %v1242_v0 = vsub.f32 1.0, %v1241_v39 }
 0x2a9   :  { %v1229_v20 = vadd.f32 %v2375_v28, %v1228_v45  ;;  %v1121_v43 = vadd.f32 %v961_v30, %v945_v63  ;;  %v962_v14 = vmul.f32 %v2312_v13, %v2312_v13  ;;  %v1236_v61 = vand.u32 2147483648, %v2337_v18 }
 0x2aa   :  { %v1084_v37 = vadd.f32 0.0009, %v1068_v17  ;;  %v1223_v17 = vsel %vm1220_vm8, %v1222_v23, %v1218_v3  ;;  %v1435_v26 = vsel %vm116_vm0, %v1209_v22, 0.0  ;;  %1591 = vrcp.f32 %v2431_v40  ;;  %v2454_v3 = vpop.f32.mrf.mxu3 }
 0x2ab   :  { %v1169_v39 = vadd.f32 0.0009, %v1153_v34  ;;  %v1256_v22 = vmul.f32 %v2435_v12, %v2351_v24  ;;  %v1243_v49 = vmul.f32 %v2398_v53, %v1242_v0  ;;  %v1010_v55 = vsub.f32 %v2382_v29, %v962_v14 }
 0x2ac   :  { %v1100_v44 = vmul.f32 %v1084_v37, %v1052_v47  ;;  %v994_v37 = vsub.f32 %v2373_v48, %v946_v58  ;;  %v1137_v48 = vadd.f32 0.0001, %v1121_v43  ;;  %v1237_v23 = vor.u32 1.1754944e-38, %v1236_v61 }
 0x2ad   :  { %v897_v27 = vpop.f32.mrf.mxu2  ;;  %v947_v34 = vmul.f32 %v2231_v2, %v2231_v2  ;;  %vm1275_vm7 = vweird.f32 %v2431_v40 }
 0x2ae   :  { %v1224_v15 = vmul.f32 %v1223_v17, %v1100_v44  ;;  %v1021_v52 = vsub.f32 %v897_v27, %v973_v59  ;;  %v1234_v59 = vand.u32 2147483647, %v2337_v18  ;;  %v1233_v18 = vsel %vm2448_vm11, %v2375_v28, %v1229_v20  ;;  %v2465_v17 = vpop.f32.mrf.mxu1 }
 0x2af   :  { %v975_v44 = vmul.f32 %v2298_v60, %v2214_v7  ;;  %v1154_v28 = vadd.f32 %v1010_v55, %v994_v37  ;;  %v1244_v7 = vadd.f32 %v2398_v53, %v1243_v49  ;;  %v1257_v60 = vsub.f32 1.0, %v1256_v22 }
 0x2b0   :  { %v1436_v6 = vsel %vm116_vm0, %v1224_v15, 0.0  ;;  %v1069_v47 = vmul.f32 2.0, %v1021_v52  ;;  %vm1235_vm12 = vcmp.eq.f32.partialorder %v1234_v59, 8.507059e+37  ;;  %v1054_v15 = vadd.f32 0.0001, %v1038_v50  ;;  %v2472_v61 = vpop.eup %1591 }
 0x2b1   :  { %v1437_v63 = vadd.f32 %v1436_v6, %v1435_v26  ;;  %v2467_v52 = vmul.f32 %v1169_v39, %v1137_v48  ;;  %v1238_v20 = vsel %vm1235_vm12, %v1237_v23, %v1233_v18  ;;  %v1122_v26 = vadd.f32 %v962_v14, %v946_v58 }
 0x2b2   :  { %v1085_v45 = vadd.f32 0.0009, %v1069_v47  ;;  %v1251_v50 = vand.u32 2147483648, %v2344_v21  ;;  %v1039_v6 = vmul.f32 2.0, %v975_v44  ;;  %v1249_v39 = vand.u32 2147483647, %v2344_v21  ;;  %v2499_v55 = vpop.f32.mrf.mxu3 }
 0x2b3   :  { %1593 = vrcp.f32 %v2467_v52  ;;  %v995_v37 = vsub.f32 %v2403_v38, %v947_v34  ;;  %v1271_v14 = vmul.f32 %v2472_v61, %v2431_v40  ;;  %v1248_v21 = vsel %vm2484_vm15, %v2398_v53, %v1244_v7 }
 0x2b4   :  { %v1101_v27 = vmul.f32 %v1085_v45, %v1053_v46  ;;  %v963_v46 = vmul.f32 %v2316_v35, %v2316_v35  ;;  %v1258_v45 = vmul.f32 %v2435_v12, %v1257_v60  ;;  %v1138_v18 = vadd.f32 0.0001, %v1122_v26 }
 0x2b5   :  { %v900_v0 = vpop.f32.mrf.mxu2  ;;  %v976_v49 = vmul.f32 %v2304_v33, %v2219_v62  ;;  %v948_v48 = vmul.f32 %v2238_v8, %v2238_v8  ;;  %vm1250_vm1 = vcmp.eq.f32.partialorder %v1249_v39, 8.507059e+37  ;;  %v1272_v33 = vsub.f32 1.0, %v1271_v14 }
 0x2b6   :  { %v1239_v29 = vmul.f32 %v1238_v20, %v1101_v27  ;;  %v1022_v43 = vsub.f32 %v900_v0, %v2409_v54  ;;  %v1170_v54 = vadd.f32 0.0009, %v1154_v28  ;;  %v1011_v38 = vsub.f32 %v2421_v57, %v963_v46  ;;  %v2504_v57 = vpop.f32.mrf.mxu1 }
 0x2b7   :  { %v1055_v27 = vadd.f32 0.0001, %v1039_v6  ;;  %v1259_v62 = vadd.f32 %v2435_v12, %v1258_v45  ;;  %v1123_v60 = vadd.f32 %v963_v46, %v947_v34  ;;  %v1266_v26 = vand.u32 2147483648, %v2351_v24 }
 0x2b8   :  { %v1438_v47 = vsel %vm116_vm0, %v1239_v29, 0.0  ;;  %v1070_v59 = vmul.f32 2.0, %v1022_v43  ;;  %v2501_v28 = vmul.f32 %v1170_v54, %v1138_v18  ;;  %v1155_v53 = vadd.f32 %v1011_v38, %v995_v37 }
 0x2b9   :  { %v1439_v30 = vadd.f32 %v1438_v47, %v1437_v63  ;;  %v1252_v63 = vor.u32 1.1754944e-38, %v1251_v50  ;;  %v2507_v7 = vpop.eup %1593  ;;  %v1040_v50 = vmul.f32 2.0, %v976_v49  ;;  %v996_v39 = vsub.f32 %v2454_v3, %v948_v48 }
 0x2ba   :  { %v1086_v22 = vadd.f32 0.0009, %v1070_v59  ;;  %v1264_v59 = vand.u32 2147483647, %v2351_v24  ;;  %1595 = vrcp.f32 %v2501_v28  ;;  %v1286_v46 = vmul.f32 %v2507_v7, %v2467_v52 }
 0x2bb   :  { %v1253_v20 = vsel %vm1250_vm1, %v1252_v63, %v1248_v21  ;;  %v1263_v24 = vsel %vm2519_vm4, %v2435_v12, %v1259_v62  ;;  %v1273_v58 = vmul.f32 %v2472_v61, %v1272_v33  ;;  %v1139_v14 = vadd.f32 0.0001, %v1123_v60 }
 0x2bc   :  { %v1102_v23 = vmul.f32 %v1086_v22, %v1054_v15  ;;  %v964_v15 = vmul.f32 %v2321_v4, %v2321_v4  ;;  %v977_v22 = vmul.f32 %v2308_v51, %v2223_v42  ;;  %v949_v21 = vmul.f32 %v2243_v16, %v2243_v16 }
 0x2bd   :  { %v903_v0 = vpop.f32.mrf.mxu2  ;;  %vm1265_vm5 = vcmp.eq.f32.partialorder %v1264_v59, 8.507059e+37  ;;  %v1056_v18 = vadd.f32 0.0001, %v1040_v50  ;;  %vm1276_vm6 = vweird.f32 %v2472_v61  ;;  %v1287_v42 = vsub.f32 1.0, %v1286_v46 }
 0x2be   :  { %v1254_v29 = vmul.f32 %v1253_v20, %v1102_v23  ;;  %v1023_v43 = vsub.f32 %v903_v0, %v975_v44  ;;  %v1171_v44 = vadd.f32 0.0009, %v1155_v53  ;;  %v1012_v3 = vsub.f32 %v2465_v17, %v964_v15  ;;  %v2537_v53 = vpop.f32.mrf.mxu3  ;;  %v859_v33 = vpop.f32.mrf.mxu1  ;;  %vm2552_vm8 = vmor %vm1275_vm7, %vm1276_vm6 }
 0x2bf   :  { %v1274_v0 = vadd.f32 %v2472_v61, %v1273_v58  ;;  %v1041_v62 = vmul.f32 2.0, %v977_v22  ;;  %v978_v34 = vmul.f32 %v2312_v13, %v2227_v36  ;;  %v950_v46 = vmul.f32 %v2248_v19, %v2248_v19 }
 0x2c0   :  { %v1440_v6 = vsel %vm116_vm0, %v1254_v29, 0.0  ;;  %v1071_v47 = vmul.f32 2.0, %v1023_v43  ;;  %v2534_v38 = vmul.f32 %v1171_v44, %v1139_v14  ;;  %v1156_v63 = vadd.f32 %v1012_v3, %v996_v39  ;;  %v2540_v51 = vpop.eup %1595 }
 0x2c1   :  { %v1441_v54 = vadd.f32 %v1440_v6, %v1439_v30  ;;  %v1267_v30 = vor.u32 1.1754944e-38, %v1266_v26  ;;  %v1124_v29 = vadd.f32 %v964_v15, %v948_v48  ;;  %v1281_v43 = vand.u32 2147483648, %v2431_v40 }
 0x2c2   :  { %v1087_v37 = vadd.f32 0.0009, %v1071_v47  ;;  %1597 = vrcp.f32 %v2534_v38  ;;  %v1172_v50 = vadd.f32 0.0009, %v1156_v63  ;;  %v997_v6 = vsub.f32 %v2499_v55, %v949_v21 }
 0x2c3   :  { %v1268_v23 = vsel %vm1265_vm5, %v1267_v30, %v1263_v24  ;;  %v1301_v47 = vmul.f32 %v2540_v51, %v2501_v28  ;;  %v1288_v44 = vmul.f32 %v2507_v7, %v1287_v42  ;;  %v1140_v39 = vadd.f32 0.0001, %v1124_v29 }
 0x2c4   :  { %v1103_v45 = vmul.f32 %v1087_v37, %v1055_v27  ;;  %v965_v27 = vmul.f32 %v2328_v10, %v2328_v10  ;;  %v1057_v24 = vadd.f32 0.0001, %v1041_v62  ;;  %vm1291_vm10 = vweird.f32 %v2507_v7 }
 0x2c5   :  { %v906_v12 = vpop.f32.mrf.mxu2  ;;  %v2567_v58 = vmul.f32 %v1172_v50, %v1140_v39  ;;  %v1302_v63 = vsub.f32 1.0, %v1301_v47  ;;  %v966_v13 = vmul.f32 %v2335_v5, %v2335_v5  ;;  %vm1290_vm11 = vweird.f32 %v2467_v52 }
 0x2c6   :  { %v1269_v17 = vmul.f32 %v1268_v23, %v1103_v45  ;;  %v1024_v20 = vsub.f32 %v906_v12, %v976_v49  ;;  %v1279_v49 = vand.u32 2147483647, %v2431_v40  ;;  %v1278_v40 = vsel %vm2552_vm8, %v2472_v61, %v1274_v0  ;;  %vm2583_vm12 = vmor %vm1290_vm11, %vm1291_vm10  ;;  %v862_v62 = vpop.f32.mrf.mxu1 }
 0x2c7   :  { %v1013_v55 = vsub.f32 %v2504_v57, %v965_v27  ;;  %v1289_v57 = vadd.f32 %v2507_v7, %v1288_v44  ;;  %v1125_v36 = vadd.f32 %v965_v27, %v949_v21  ;;  %v1042_v12 = vmul.f32 2.0, %v978_v34 }
 0x2c8   :  { %v1442_v60 = vsel %vm116_vm0, %v1269_v17, 0.0  ;;  %v1072_v26 = vmul.f32 2.0, %v1024_v20  ;;  %vm1280_vm9 = vcmp.eq.f32.partialorder %v1279_v49, 8.507059e+37  ;;  %v2571_v23 = vpop.eup %1597  ;;  %v797_v17 = vpop.f32.mrf.mxu3  ;;  %1599 = vrcp.f32 %v2567_v58 }
 0x2c9   :  { %v1443_v48 = vadd.f32 %v1442_v60, %v1441_v54  ;;  %v1282_v54 = vor.u32 1.1754944e-38, %v1281_v43  ;;  %v1157_v14 = vadd.f32 %v1013_v55, %v997_v6  ;;  %v998_v29 = vsub.f32 %v2537_v53, %v950_v46 }
 0x2ca   :  { %v1088_v59 = vadd.f32 0.0009, %v1072_v26  ;;  %v1316_v43 = vmul.f32 %v2571_v23, %v2534_v38  ;;  %v1303_v26 = vmul.f32 %v2540_v51, %v1302_v63  ;;  %v979_v53 = vmul.f32 %v2316_v35, %v2231_v2 }
 0x2cb   :  { %v1283_v3 = vsel %vm1280_vm9, %v1282_v54, %v1278_v40  ;;  %v1173_v42 = vadd.f32 0.0009, %v1157_v14  ;;  %v1141_v49 = vadd.f32 0.0001, %v1125_v36  ;;  %v1014_v50 = vsub.f32 %v859_v33, %v966_v13 }
 0x2cc   :  { %v1104_v37 = vmul.f32 %v1088_v59, %v1056_v18  ;;  %v1296_v18 = vand.u32 2147483648, %v2467_v52  ;;  %v1058_v47 = vadd.f32 0.0001, %v1042_v12  ;;  %vm1306_vm14 = vweird.f32 %v2540_v51 }
 0x2cd   :  { %v909_v61 = vpop.f32.mrf.mxu2  ;;  %v2597_v59 = vmul.f32 %v1173_v42, %v1141_v49  ;;  %v1158_v40 = vadd.f32 %v1014_v50, %v998_v29  ;;  %v1304_v2 = vadd.f32 %v2540_v51, %v1303_v26  ;;  %v1317_v35 = vsub.f32 1.0, %v1316_v43 }
 0x2ce   :  { %v1284_v30 = vmul.f32 %v1283_v3, %v1104_v37  ;;  %v1025_v45 = vsub.f32 %v909_v61, %v977_v22  ;;  %v1294_v22 = vand.u32 2147483647, %v2467_v52  ;;  %v1293_v52 = vsel %vm2583_vm12, %v2507_v7, %v1289_v57  ;;  %v2601_v33 = vpop.eup %1599  ;;  %v865_v29 = vpop.f32.mrf.mxu1 }
 0x2cf   :  { %v1297_v6 = vor.u32 1.1754944e-38, %v1296_v18  ;;  %v1043_v54 = vmul.f32 2.0, %v979_v53  ;;  %v1126_v37 = vadd.f32 %v966_v13, %v950_v46  ;;  %v1311_v14 = vand.u32 2147483648, %v2501_v28 }
 0x2d0   :  { %v1444_v20 = vsel %vm116_vm0, %v1284_v30, 0.0  ;;  %v1073_v0 = vmul.f32 2.0, %v1025_v45  ;;  %vm1295_vm13 = vcmp.eq.f32.partialorder %v1294_v22, 8.507059e+37  ;;  %vm1305_vm15 = vweird.f32 %v2501_v28  ;;  %v800_v36 = vpop.f32.mrf.mxu3 }
 0x2d1   :  { %v1445_v21 = vadd.f32 %v1444_v20, %v1443_v48  ;;  %v951_v48 = vmul.f32 %v2253_v25, %v2253_v25  ;;  %v1298_v44 = vsel %vm1295_vm13, %v1297_v6, %v1293_v52  ;;  %v1309_v30 = vand.u32 2147483647, %v2501_v28  ;;  %vm2612_vm1 = vmor %vm1305_vm15, %vm1306_vm14 }
 0x2d2   :  { %v1089_v60 = vadd.f32 0.0009, %v1073_v0  ;;  %1601 = vrcp.f32 %v2597_v59  ;;  %v1331_v63 = vmul.f32 %v2601_v33, %v2567_v58  ;;  %v1308_v28 = vsel %vm2612_vm1, %v2540_v51, %v1304_v2 }
 0x2d3   :  { %v999_v45 = vsub.f32 %v797_v17, %v951_v48  ;;  %v1318_v18 = vmul.f32 %v2571_v23, %v1317_v35  ;;  %v980_v12 = vmul.f32 %v2321_v4, %v2238_v8  ;;  %v1142_v17 = vadd.f32 0.0001, %v1126_v37 }
 0x2d4   :  { %v1105_v15 = vmul.f32 %v1089_v60, %v1057_v24  ;;  %v967_v24 = vmul.f32 %v2342_v56, %v2342_v56  ;;  %v1312_v0 = vor.u32 1.1754944e-38, %v1311_v14  ;;  %v952_v22 = vmul.f32 %v2258_v9, %v2258_v9 }
 0x2d5   :  { %v912_v39 = vpop.f32.mrf.mxu2  ;;  %v1059_v42 = vadd.f32 0.0001, %v1043_v54  ;;  %vm1310_vm2 = vcmp.eq.f32.partialorder %v1309_v30, 8.507059e+37  ;;  %vm1321_vm3 = vweird.f32 %v2571_v23  ;;  %v1319_v8 = vadd.f32 %v2571_v23, %v1318_v18 }
 0x2d6   :  { %v1299_v7 = vmul.f32 %v1298_v44, %v1105_v15  ;;  %v1026_v55 = vsub.f32 %v912_v39, %v978_v34  ;;  %v1174_v34 = vadd.f32 0.0009, %v1158_v40  ;;  %v1015_v20 = vsub.f32 %v862_v62, %v967_v24 }
 0x2d7   :  { %v1313_v60 = vsel %vm1310_vm2, %v1312_v0, %v1308_v28  ;;  %v1332_v4 = vsub.f32 1.0, %v1331_v63  ;;  %v1044_v49 = vmul.f32 2.0, %v980_v12  ;;  %v1127_v50 = vadd.f32 %v967_v24, %v951_v48  ;;  %v868_v63 = vpop.f32.mrf.mxu1 }
 0x2d8   :  { %v1446_v3 = vsel %vm116_vm0, %v1299_v7, 0.0  ;;  %v1074_v61 = vmul.f32 2.0, %v1026_v55  ;;  %v2626_v27 = vmul.f32 %v1174_v34, %v1142_v17  ;;  %v1159_v43 = vadd.f32 %v1015_v20, %v999_v45  ;;  %v2630_v62 = vpop.eup %1601  ;;  %v803_v30 = vpop.f32.mrf.mxu3 }
 0x2d9   :  { %v1447_v57 = vadd.f32 %v1446_v3, %v1445_v21  ;;  %v968_v6 = vmul.f32 %v2349_v32, %v2349_v32  ;;  %v1326_v15 = vand.u32 2147483648, %v2534_v38  ;;  %vm1320_vm4 = vweird.f32 %v2534_v38 }
 0x2da   :  { %v1090_v13 = vadd.f32 0.0009, %v1074_v61  ;;  %v1324_v44 = vand.u32 2147483647, %v2534_v38  ;;  %1603 = vrcp.f32 %v2626_v27  ;;  %v1000_v39 = vsub.f32 %v800_v36, %v952_v22  ;;  %vm2641_vm5 = vmor %vm1320_vm4, %vm1321_vm3 }
 0x2db   :  { %v1346_v55 = vmul.f32 %v2630_v62, %v2597_v59  ;;  %v1323_v35 = vsel %vm2641_vm5, %v2571_v23, %v1319_v8  ;;  %v1333_v38 = vmul.f32 %v2601_v33, %v1332_v4  ;;  %v981_v54 = vmul.f32 %v2328_v10, %v2243_v16 }
 0x2dc   :  { %v1106_v21 = vmul.f32 %v1090_v13, %v1058_v47  ;;  %v1143_v37 = vadd.f32 0.0001, %v1127_v50  ;;  %v1016_v24 = vsub.f32 %v865_v29, %v968_v6  ;;  %v1327_v14 = vor.u32 1.1754944e-38, %v1326_v15 }
 0x2dd   :  { %v915_v51 = vpop.f32.mrf.mxu2  ;;  %v953_v3 = vmul.f32 %v2263_v11, %v2263_v11  ;;  %v1060_v61 = vadd.f32 0.0001, %v1044_v49  ;;  %vm1325_vm6 = vcmp.eq.f32.partialorder %v1324_v44, 8.507059e+37  ;;  %vm1336_vm7 = vweird.f32 %v2601_v33 }
 0x2de   :  { %v1314_v52 = vmul.f32 %v1313_v60, %v1106_v21  ;;  %v1027_v26 = vsub.f32 %v915_v51, %v979_v53  ;;  %v1175_v53 = vadd.f32 0.0009, %v1159_v43  ;;  %v1328_v46 = vsel %vm1325_vm6, %v1327_v14, %v1323_v35 }
 0x2df   :  { %v1334_v10 = vadd.f32 %v2601_v33, %v1333_v38  ;;  %v1347_v13 = vsub.f32 1.0, %v1346_v55  ;;  %v1045_v18 = vmul.f32 2.0, %v981_v54  ;;  %v1128_v17 = vadd.f32 %v968_v6, %v952_v22 }
 0x2e0   :  { %v1448_v47 = vsel %vm116_vm0, %v1314_v52, 0.0  ;;  %v1075_v40 = vmul.f32 2.0, %v1027_v26  ;;  %v2655_v45 = vmul.f32 %v1175_v53, %v1143_v37  ;;  %v2659_v28 = vpop.eup %1603  ;;  %v969_v20 = vmul.f32 %v2355_v41, %v2355_v41  ;;  %v806_v53 = vpop.f32.mrf.mxu3 }
 0x2e1   :  { %v1449_v7 = vadd.f32 %v1448_v47, %v1447_v57  ;;  %v1160_v57 = vadd.f32 %v1016_v24, %v1000_v39  ;;  %v1341_v0 = vand.u32 2147483648, %v2567_v58  ;;  %vm1335_vm8 = vweird.f32 %v2567_v58  ;;  %v871_v24 = vpop.f32.mrf.mxu1 }
 0x2e2   :  { %v1091_v2 = vadd.f32 0.0009, %v1075_v40  ;;  %v1339_v21 = vand.u32 2147483647, %v2567_v58  ;;  %1605 = vrcp.f32 %v2655_v45  ;;  %v1001_v43 = vsub.f32 %v803_v30, %v953_v3  ;;  %vm1337_vm9 = vmor %vm1335_vm8, %vm1336_vm7 }
 0x2e3   :  { %v1361_v22 = vmul.f32 %v2659_v28, %v2626_v27  ;;  %v1338_v52 = vsel %vm1337_vm9, %v2601_v33, %v1334_v10  ;;  %v1348_v26 = vmul.f32 %v2630_v62, %v1347_v13  ;;  %v1144_v8 = vadd.f32 0.0001, %v1128_v17 }
 0x2e4   :  { %v1107_v34 = vmul.f32 %v1091_v2, %v1059_v42  ;;  %v1017_v4 = vsub.f32 %v868_v63, %v969_v20  ;;  %v1342_v49 = vor.u32 1.1754944e-38, %v1341_v0  ;;  %v954_v58 = vmul.f32 %v2268_v31, %v2268_v31 }
 0x2e5   :  { %v918_v23 = vpop.f32.mrf.mxu2  ;;  %v1061_v50 = vadd.f32 0.0001, %v1045_v18  ;;  %vm1340_vm10 = vcmp.eq.f32.partialorder %v1339_v21, 8.507059e+37  ;;  %vm1351_vm11 = vweird.f32 %v2630_v62  ;;  %v1362_v48 = vsub.f32 1.0, %v1361_v22 }
 0x2e6   :  { %v1329_v36 = vmul.f32 %v1328_v46, %v1107_v34  ;;  %v1028_v16 = vsub.f32 %v918_v23, %v980_v12  ;;  %v1176_v12 = vadd.f32 0.0009, %v1160_v57  ;;  %v1161_v47 = vadd.f32 %v1017_v4, %v1001_v43 }
 0x2e7   :  { %v1343_v40 = vsel %vm1340_vm10, %v1342_v49, %v1338_v52  ;;  %v982_v2 = vmul.f32 %v2335_v5, %v2248_v19  ;;  %v1129_v35 = vadd.f32 %v969_v20, %v953_v3  ;;  %v970_v38 = vmul.f32 %v2362_v1, %v2362_v1 }
 0x2e8   :  { %v1450_v42 = vsel %vm116_vm0, %v1329_v36, 0.0  ;;  %v1076_v29 = vmul.f32 2.0, %v1028_v16  ;;  %v2676_v15 = vmul.f32 %v1176_v12, %v1144_v8  ;;  %v2680_v55 = vpop.eup %1605  ;;  %v1356_v37 = vand.u32 2147483648, %v2597_v59 }
 0x2e9   :  { %v1451_v60 = vadd.f32 %v1450_v42, %v1449_v7  ;;  %v1349_v7 = vadd.f32 %v2630_v62, %v1348_v26  ;;  %vm1350_vm12 = vweird.f32 %v2597_v59  ;;  %v1177_v30 = vadd.f32 0.0009, %v1161_v47 }
 0x2ea   :  { %v1092_v51 = vadd.f32 0.0009, %v1076_v29  ;;  %1607 = vrcp.f32 %v2676_v15  ;;  %v1002_v34 = vsub.f32 %v806_v53, %v954_v58  ;;  %vm1352_vm13 = vmor %vm1350_vm12, %vm1351_vm11  ;;  %v1376_v19 = vmul.f32 %v2680_v55, %v2655_v45 }
 0x2eb   :  { %v1353_v3 = vsel %vm1352_vm13, %v2630_v62, %v1349_v7  ;;  %v1363_v46 = vmul.f32 %v2659_v28, %v1362_v48  ;;  %v1046_v23 = vmul.f32 2.0, %v982_v2  ;;  %v1145_v63 = vadd.f32 0.0001, %v1129_v35 }
 0x2ec   :  { %v1108_v6 = vmul.f32 %v1092_v51, %v1060_v61  ;;  %v1018_v36 = vsub.f32 %v871_v24, %v970_v38  ;;  %vm1366_vm15 = vweird.f32 %v2659_v28  ;;  %v1377_v62 = vsub.f32 1.0, %v1376_v19 }
 0x2ed   :  { %v921_v44 = vpop.f32.mrf.mxu2  ;;  %v2697_v10 = vmul.f32 %v1177_v30, %v1145_v63  ;;  %v1364_v42 = vadd.f32 %v2659_v28, %v1363_v46  ;;  %v1062_v21 = vadd.f32 0.0001, %v1046_v23  ;;  %v1130_v12 = vadd.f32 %v970_v38, %v954_v58 }
 0x2ee   :  { %v1344_v33 = vmul.f32 %v1343_v40, %v1108_v6  ;;  %v1029_v39 = vsub.f32 %v921_v44, %v981_v54  ;;  %v1354_v54 = vand.u32 2147483647, %v2597_v59  ;;  %v1357_v59 = vor.u32 1.1754944e-38, %v1356_v37 }
 0x2ef   :  { %v1162_v13 = vadd.f32 %v1018_v36, %v1002_v34  ;;  %v1371_v43 = vand.u32 2147483648, %v2626_v27  ;;  %vm1365_vm1 = vweird.f32 %v2626_v27  ;;  %v1369_v51 = vand.u32 2147483647, %v2626_v27 }
 0x2f0   :  { %v1452_v14 = vsel %vm116_vm0, %v1344_v33, 0.0  ;;  %v1077_v61 = vmul.f32 2.0, %v1029_v39  ;;  %vm1355_vm14 = vcmp.eq.f32.partialorder %v1354_v54, 8.507059e+37  ;;  %v2701_v29 = vpop.eup %1607  ;;  %v983_v52 = vmul.f32 %v2342_v56, %v2253_v25  ;;  %vm1367_vm2 = vmor %vm1365_vm1, %vm1366_vm15 }
 0x2f1   :  { %v1453_v57 = vadd.f32 %v1452_v14, %v1451_v60  ;;  %v1358_v18 = vsel %vm1355_vm14, %v1357_v59, %v1353_v3  ;;  %1609 = vrcp.f32 %v2697_v10  ;;  %v1178_v26 = vadd.f32 0.0009, %v1162_v13 }
 0x2f2   :  { %v1093_v5 = vadd.f32 0.0009, %v1077_v61  ;;  %v1391_v4 = vmul.f32 %v2701_v29, %v2676_v15  ;;  %v1368_v58 = vsel %vm1367_vm2, %v2659_v28, %v1364_v42  ;;  %v1146_v6 = vadd.f32 0.0001, %v1130_v12 }
 0x2f3   :  { %v1372_v27 = vor.u32 1.1754944e-38, %v1371_v43  ;;  %vm1370_vm3 = vcmp.eq.f32.partialorder %v1369_v51, 8.507059e+37  ;;  %v1047_v25 = vmul.f32 2.0, %v983_v52  ;;  %vm1381_vm4 = vweird.f32 %v2680_v55 }
 0x2f4   :  { %v1109_v16 = vmul.f32 %v1093_v5, %v1061_v50  ;;  %v1378_v50 = vmul.f32 %v2680_v55, %v1377_v62  ;;  %v2716_v56 = vmul.f32 %v1178_v26, %v1146_v6  ;;  %v1392_v7 = vsub.f32 1.0, %v1391_v4 }
 0x2f5   :  { %v924_v17 = vpop.f32.mrf.mxu2  ;;  %v1373_v40 = vsel %vm1370_vm3, %v1372_v27, %v1368_v58  ;;  %v1386_v28 = vand.u32 2147483648, %v2655_v45  ;;  %vm1380_vm5 = vweird.f32 %v2655_v45  ;;  %v1384_v38 = vand.u32 2147483647, %v2655_v45 }
 0x2f6   :  { %v1359_v20 = vmul.f32 %v1358_v18, %v1109_v16  ;;  %v1030_v0 = vsub.f32 %v924_v17, %v982_v2  ;;  %v1379_v39 = vadd.f32 %v2680_v55, %v1378_v50  ;;  %v1063_v37 = vadd.f32 0.0001, %v1047_v25  ;;  %vm1382_vm6 = vmor %vm1380_vm5, %vm1381_vm4 }
 0x2f7   :  { %v2720_v48 = vpop.eup %1609  ;;  %v984_v24 = vmul.f32 %v2349_v32, %v2258_v9  ;;  %1611 = vrcp.f32 %v2716_v56  ;;  %v1393_v30 = vmul.f32 %v2701_v29, %v1392_v7  ;;  %vm1385_vm7 = vcmp.eq.f32.partialorder %v1384_v38, 8.507059e+37 }
 0x2f8   :  { %v1454_v60 = vsel %vm116_vm0, %v1359_v20, 0.0  ;;  %v1078_v22 = vmul.f32 2.0, %v1030_v0  ;;  %v1383_v54 = vsel %vm1382_vm6, %v2680_v55, %v1379_v39  ;;  %v1406_v34 = vmul.f32 %v2720_v48, %v2697_v10 }
 0x2f9   :  { %v1455_v8 = vadd.f32 %v1454_v60, %v1453_v57  ;;  %v1387_v57 = vor.u32 1.1754944e-38, %v1386_v28  ;;  %v1048_v45 = vmul.f32 2.0, %v984_v24  ;;  %vm1396_vm8 = vweird.f32 %v2701_v29 }
 0x2fa   :  { %v1094_v49 = vadd.f32 0.0009, %v1078_v22  ;;  %v1394_v46 = vadd.f32 %v2701_v29, %v1393_v30  ;;  %v1407_v23 = vsub.f32 1.0, %v1406_v34  ;;  %v1401_v55 = vand.u32 2147483648, %v2676_v15 }
 0x2fb   :  { %v1388_v5 = vsel %vm1385_vm7, %v1387_v57, %v1383_v54  ;;  %vm1395_vm9 = vweird.f32 %v2676_v15  ;;  %v1399_v59 = vand.u32 2147483647, %v2676_v15  ;;  %v1064_v13 = vadd.f32 0.0001, %v1048_v45 }
 0x2fc   :  { %v1110_v47 = vmul.f32 %v1094_v49, %v1062_v21  ;;  %v985_v18 = vmul.f32 %v2355_v41, %v2263_v11  ;;  %vm1397_vm10 = vmor %vm1395_vm9, %vm1396_vm8  ;;  %v1408_v42 = vmul.f32 %v2720_v48, %v1407_v23  ;;  %v1402_v21 = vor.u32 1.1754944e-38, %v1401_v55 }
 0x2fd   :  { %v927_v44 = vpop.f32.mrf.mxu2  ;;  %v1612_v63 = vpop.eup %1611  ;;  %v1398_v0 = vsel %vm1397_vm10, %v2701_v29, %v1394_v46  ;;  %vm1400_vm11 = vcmp.eq.f32.partialorder %v1399_v59, 8.507059e+37  ;;  %vm1411_vm12 = vweird.f32 %v2720_v48  ;;  %vm1410_vm13 = vweird.f32 %v2697_v10 }
 0x2fe   :  { %v1374_v53 = vmul.f32 %v1373_v40, %v1110_v47  ;;  %v1031_v33 = vsub.f32 %v927_v44, %v983_v52  ;;  %v1421_v62 = vmul.f32 %v1612_v63, %v2716_v56  ;;  %v1049_v43 = vmul.f32 2.0, %v985_v18  ;;  %vm1412_vm14 = vmor %vm1410_vm13, %vm1411_vm12 }
 0x2ff   :  { %v1403_v15 = vsel %vm1400_vm11, %v1402_v21, %v1398_v0  ;;  %v1409_v11 = vadd.f32 %v2720_v48, %v1408_v42  ;;  %v1416_v52 = vand.u32 2147483648, %v2697_v10  ;;  %v1414_v26 = vand.u32 2147483647, %v2697_v10 }
 0x300   :  { %v1456_v2 = vsel %vm116_vm0, %v1374_v53, 0.0  ;;  %v1079_v35 = vmul.f32 2.0, %v1031_v33  ;;  %v1422_v41 = vsub.f32 1.0, %v1421_v62  ;;  %v986_v4 = vmul.f32 %v2362_v1, %v2268_v31 }
 0x301   :  { %v1457_v14 = vadd.f32 %v1456_v2, %v1455_v8  ;;  %v1065_v58 = vadd.f32 0.0001, %v1049_v43  ;;  %v1413_v6 = vsel %vm1412_vm14, %v2720_v48, %v1409_v11  ;;  %v1417_v47 = vor.u32 1.1754944e-38, %v1416_v52 }
 0x302   :  { %v1095_v61 = vadd.f32 0.0009, %v1079_v35  ;;  %v1423_v27 = vmul.f32 %v1612_v63, %v1422_v41  ;;  %vm1415_vm15 = vcmp.eq.f32.partialorder %v1414_v26, 8.507059e+37  ;;  %v1050_v40 = vmul.f32 2.0, %v986_v4 }
 0x303   :  { %v1418_v53 = vsel %vm1415_vm15, %v1417_v47, %v1413_v6  ;;  %vm1426_vm1 = vweird.f32 %v1612_v63  ;;  %v1431_v7 = vand.u32 2147483648, %v2716_v56  ;;  %vm1425_vm2 = vweird.f32 %v2716_v56 }
 0x304   :  { %v1111_v19 = vmul.f32 %v1095_v61, %v1063_v37  ;;  %v1424_v39 = vadd.f32 %v1612_v63, %v1423_v27  ;;  %v1429_v1 = vand.u32 2147483647, %v2716_v56  ;;  %vm1427_vm3 = vmor %vm1425_vm2, %vm1426_vm1  ;;  %v1066_v2 = vadd.f32 0.0001, %v1050_v40 }
 0x305   :  { %v930_v3 = vpop.f32.mrf.mxu2  ;;  %v1432_v37 = vor.u32 1.1754944e-38, %v1431_v7 }
 0x306   :  { %v1389_v9 = vmul.f32 %v1388_v5, %v1111_v19  ;;  %v1032_v32 = vsub.f32 %v930_v3, %v984_v24  ;;  %v1428_v38 = vsel %vm1427_vm3, %v1612_v63, %v1424_v39  ;;  %vm1430_vm4 = vcmp.eq.f32.partialorder %v1429_v1, 8.507059e+37 }
 0x308   :  { %v1080_v36 = vmul.f32 2.0, %v1032_v32  ;;  %v1458_v16 = vsel %vm116_vm0, %v1389_v9, 0.0 }
 0x309   :  { %v1459_v17 = vadd.f32 %v1458_v16, %v1457_v14  ;;  %v1433_v14 = vsel %vm1430_vm4, %v1432_v37, %v1428_v38 }
 0x30a   :  { %v1096_v20 = vadd.f32 0.0009, %v1080_v36 }
 0x30c   :  { %v1112_v12 = vmul.f32 %v1096_v20, %v1064_v13 }
 0x30d   :  { %v933_v60 = vpop.f32.mrf.mxu2 }
 0x30e   :  { %v1404_v22 = vmul.f32 %v1403_v15, %v1112_v12  ;;  %v1033_v51 = vsub.f32 %v933_v60, %v985_v18 }
 0x310   :  { %v1081_v29 = vmul.f32 2.0, %v1033_v51  ;;  %v1460_v8 = vsel %vm116_vm0, %v1404_v22, 0.0 }
 0x311   :  { %v1461_v49 = vadd.f32 %v1460_v8, %v1459_v17 }
 0x312   :  { %v1097_v50 = vadd.f32 0.0009, %v1081_v29 }
 0x314   :  { %v1113_v25 = vmul.f32 %v1097_v50, %v1065_v58 }
 0x315   :  { %v936_v44 = vpop.f32.mrf.mxu2 }
 0x316   :  { %v1034_v33 = vsub.f32 %v936_v44, %v986_v4  ;;  %v1419_v10 = vmul.f32 %v1418_v53, %v1113_v25 }
 0x318   :  { %v1082_v31 = vmul.f32 2.0, %v1034_v33  ;;  %v1462_v48 = vsel %vm116_vm0, %v1419_v10, 0.0 }
 0x319   :  { %v1463_v28 = vadd.f32 %v1462_v48, %v1461_v49 }
 0x31a   :  { %v1098_v35 = vadd.f32 0.0009, %v1082_v31 }
 0x31c   :  { %v1114_v24 = vmul.f32 %v1098_v35, %v1066_v2 }
 0x31e   :  { %v1434_v61 = vmul.f32 %v1433_v14, %v1114_v24 }
 0x320   :  { %v1464_v54 = vsel %vm116_vm0, %v1434_v61, 0.0 }
 0x321   :  { %v1465_v30 = vadd.f32 %v1464_v54, %v1463_v28 }
 0x323   :  { %1466 = vadd.xlane.f32.xlu0 %v1465_v30 }
 0x396   :  { %v1467_v34 = vpop.xlane.xlu0 %1466 }
 0x397   :  { %v1468_v57 = vrot.slane %v1467_v34, 4 }
 0x399   :  { %v1469_v19 = vadd.f32 %v1468_v57, %v1467_v34 }
 0x39b   :  { %v1470_v56 = vrot.slane %v1469_v19, 2 }
 0x39d   :  { %v1471_v45 = vadd.f32 %v1470_v56, %v1469_v19 }
 0x39f   :  { %v1472_v5 = vrot.slane %v1471_v45, 1 }
 0x3a1   :  { %v1473_v3 = vadd.f32 %v1472_v5, %v1471_v45 }
 0x3a3   :  { %1578 = vpush %v1473_v3 }
 0x3d4   :  { %s1579_s5 = spop %1578 }
 0x3d5   :  { %1476 = sst [smem:[#allocation2]] %s1579_s5 }
 0x3d6   :  { %1485 = dma.smem_to_hbm %s1627_s6, 16, %s1483_s30, [#allocation3]  }
 0x3d7   :  { %1625 = dma.done.wait [#allocation3], 16  }
 0x3d8   :  { %1626 = vsyncadd [#allocation3], 4294967280 }
 0x3d9   :  { %1490 = sfence }
 0x3da   :  { %1491 = vsyncpa [#allocation3], 1 }

</bundles_post_ra>
